<compile_context>
chip_gen: v7x
topology: tpu7x:2x2x1
jax: 0.10.0
libtpu: 0.0.40
codegen_flags: <defaults>
</compile_context>

<pallas_src>
import functools

import jax
import jax.numpy as jnp
from jax import lax
from jax.experimental import pallas as pl
from jax.experimental.pallas import tpu as pltpu

# ----------------------------- config (small) -------------------------------
B = 2
SPATIAL_DIMS = 2
IMG = 32            # small stand-in for 224
PATCH = 16          # as in the module
IN_CH = 2
OUT_CH = 2
HIDDEN = 64
NUM_HEADS = 4
MLP_DIM = 128
NUM_LAYERS = 2
DECONV_CH = 8       # small stand-in for 16
UP_K = 4            # sqrt(patch_size)
GRID_N = IMG // PATCH
N_PATCHES = GRID_N * GRID_N
PATCH_DIM = PATCH * PATCH * IN_CH
LN_EPS = 1e-5

ROWS = B * N_PATCHES                               # 8   token rows (batch folded)
HR = NUM_HEADS * ROWS                              # 32  per-head expanded rows
HEAD_DIM = HIDDEN // NUM_HEADS
DC_COLS = UP_K * UP_K * DECONV_CH                  # 128 (deconv-1 output cols)
OUT_COLS = UP_K * UP_K * OUT_CH * UP_K * UP_K      # 512 (deconv-2 output cols)


# ------------------------------- kernel --------------------------------------
def _ln(x, g, b, eps):
    mu = jnp.mean(x, axis=-1, keepdims=True)
    var = jnp.mean(jnp.square(x - mu), axis=-1, keepdims=True)
    return (x - mu) * lax.rsqrt(var + eps) * g + b


def _fused_model_kernel(patches_ref, w_pe_ref, pos_ref,
                        w_qkv_ref, w_out_ref, w1_ref, w2_ref,
                        ch_ref, b1_ref,
                        head_mask_ref, batch_mask_ref, blk_ref,
                        ln_f_ref, w_dc1_ref, w_dc2_ref, b_dc2_ref,
                        o_ref, *, num_layers, num_heads, eps):
    f32 = jnp.float32
    bf16 = jnp.bfloat16

    # ---- patch embedding: Linear(rearranged patches); bias + pos pre-folded ----
    x = jnp.dot(patches_ref[...], w_pe_ref[...], preferred_element_type=f32)
    x = x + pos_ref[...]                                   # (R, H) f32

    rows, hidden = x.shape
    dh = hidden // num_heads
    scale = dh ** -0.5

    head_mask = head_mask_ref[...]     # (HR, H)  bf16  per-head block mask
    batch_mask = batch_mask_ref[...]   # (R, HR)  f32   additive 0 / -1e30
    blk = blk_ref[...]                 # (HR, HR) f32   per-head denom blocks

    for l in range(num_layers):        # statically unrolled (NUM_LAYERS == 2)
        c = ch_ref[l]                  # (6, H): [ln1_g, ln1_b, b_out, ln2_g, ln2_b, b_mlp2]
        g1, b1 = c[0:1], c[1:2]
        b_out = c[2:3]
        g2, b2 = c[3:4], c[4:5]
        b_mlp2 = c[5:6]

        # ---- self-attention (MONAI SABlock, qkv_bias=False), batch-folded ----
        xn = _ln(x, g1, b1, eps).astype(bf16)
        qkv = jnp.dot(xn, w_qkv_ref[l], preferred_element_type=f32)  # (R, 3H)
        q = qkv[:, 0 * hidden:1 * hidden].astype(bf16)
        k = qkv[:, 1 * hidden:2 * hidden].astype(bf16)
        v = qkv[:, 2 * hidden:3 * hidden].astype(bf16)

        # Block-diagonal per-head expansion of K / V: rows = (head, token).
        k_big = jnp.concatenate([k] * num_heads, axis=0) * head_mask  # (HR, H)
        v_big = jnp.concatenate([v] * num_heads, axis=0) * head_mask  # (HR, H)

        # Scores for every head at once: s[i, h*R + j] = <q_h[i], k_h[j]>.
        s = lax.dot_general(q, k_big, (((1,), (1,)), ((), ())),
                            preferred_element_type=f32) * scale       # (R, HR)
        s = s + batch_mask                    # same-batch attention only

        m = jnp.max(s, axis=-1, keepdims=True)            # row max (stable)
        e = jnp.exp(s - m)                                # masked cols -> 0
        # Per-head softmax denominators via one small matmul; clamp so a fully
        # underflowed head yields 0 (never 0 * inf = NaN).
        denom = jnp.dot(e, blk, preferred_element_type=f32)           # (R, HR)
        a = e * pl.reciprocal(jnp.maximum(denom, 1e-30), approx=True)

        o = jnp.dot(a.astype(bf16), v_big, preferred_element_type=f32)  # (R, H)
        attn = jnp.dot(o.astype(bf16), w_out_ref[l],
                       preferred_element_type=f32) + b_out
        x = x + attn

        # ---- MLP (MONAI MLPBlock) ----
        xn2 = _ln(x, g2, b2, eps).astype(bf16)
        h = jnp.dot(xn2, w1_ref[l], preferred_element_type=f32) + b1_ref[l]
        # TODO(synk): MONAI MLPBlock uses exact erf-GELU; tanh approximation here.
        h = jax.nn.gelu(h, approximate=True)
        mlp = jnp.dot(h.astype(bf16), w2_ref[l],
                      preferred_element_type=f32) + b_mlp2
        x = x + mlp

    # ---- decoder head: final LN + both ConvTranspose2d(k=s=4) as matmuls ----
    lnf = ln_f_ref[...]                                    # (2, H): [gamma; beta]
    xf = _ln(x, lnf[0:1], lnf[1:2], eps).astype(bf16)
    y1 = jnp.dot(xf, w_dc1_ref[...], preferred_element_type=f32)      # (R, 128)
    y2 = jnp.dot(y1.astype(bf16), w_dc2_ref[...],
                 preferred_element_type=f32) + b_dc2_ref[...]         # (R, 512)
    o_ref[...] = y2


# ----------------------------- pallas wrapper ---------------------------------
def _fused_forward(patches, params):
    kern = functools.partial(_fused_model_kernel, num_layers=NUM_LAYERS,
                             num_heads=NUM_HEADS, eps=LN_EPS)
    vmem = pl.BlockSpec(memory_space=pltpu.MemorySpace.VMEM)
    args = (patches, params['w_pe'], params['pos_full'],
            params['w_qkv'], params['w_out'], params['w1'], params['w2'],
            params['consts_h'], params['b1'],
            params['head_mask'], params['batch_mask'], params['blk'],
            params['ln_f'], params['w_dc1'], params['w_dc2'], params['b_dc2'])
    return pl.pallas_call(
        kern,
        out_shape=jax.ShapeDtypeStruct((ROWS, OUT_COLS), jnp.float32),
        in_specs=[vmem] * len(args),
        out_specs=vmem,
    )(*args)


# ------------------------------- full model ----------------------------------
def fourier_space_model(params, x):
    # complex -> real/imag channels (same branch logic as the torch module),
    # kept channel-LAST so the patch rearrange is a single axis swap and the
    # (p1 p2 c) column order matches MONAI's perceptron rearrange exactly.
    if x.ndim == SPATIAL_DIMS + 1:
        x = jnp.stack([jnp.real(x), jnp.imag(x)], axis=-1)       # (B, H, W, 2)
    elif x.ndim == SPATIAL_DIMS + 2:
        x = jnp.concatenate([jnp.real(x), jnp.imag(x)], axis=1)
        x = jnp.moveaxis(x, 1, -1)                               # NHWC
    x = x.astype(jnp.float32)

    b, hh, ww, c = x.shape
    gh, gw = hh // PATCH, ww // PATCH

    # "b (h p1)(w p2) c -> (b h w) (p1 p2 c)"  — one axis swap + reshapes.
    patches = (x.reshape(b, gh, PATCH, gw, PATCH, c)
                 .transpose(0, 1, 3, 2, 4, 5)
                 .reshape(b * gh * gw, PATCH * PATCH * c)).astype(jnp.bfloat16)

    # Whole network in one Pallas call -> lane-dense (rows, 512) f32 slab.
    y2 = _fused_forward(patches, params)

    # Undo the two folded pixel-shuffles:
    # rows = (b, gh, gw); cols = (p1, p2, oc, q1, q2)
    # out[b, oc, 16*gh + 4*p1 + q1, 16*gw + 4*p2 + q2]
    out = (y2.reshape(b, gh, gw, UP_K, UP_K, OUT_CH, UP_K, UP_K)
             .transpose(0, 5, 1, 3, 6, 2, 4, 7)
             .reshape(b, OUT_CH, gh * PATCH, gw * PATCH))
    return out


# ------------------------------- params init ---------------------------------
def init_params(key):
    keys = iter(jax.random.split(key, 32))

    def nrm(shape, std=0.02):
        return std * jax.random.normal(next(keys), shape, dtype=jnp.float32)

    H, M, L = HIDDEN, MLP_DIM, NUM_LAYERS
    bf16 = jnp.bfloat16
    p = {}

    p['w_pe'] = nrm((PATCH_DIM, H)).astype(bf16)
    b_pe = nrm((1, H))
    pos = nrm((N_PATCHES, H))
    # Positional embedding pre-broadcast over the static batch with the patch
    # embedding bias folded in -> one resident (R, H) add in the kernel.
    p['pos_full'] = (jnp.broadcast_to(pos[None], (B, N_PATCHES, H))
                       .reshape(ROWS, H) + b_pe)

    def stack(fn):
        return jnp.stack([fn() for _ in range(L)], axis=0)

    # MONAI SABlock: single qkv Linear (no bias), columns ordered [q | k | v],
    # heads contiguous inside each — kept FUSED (one 192-lane matmul in-kernel).
    p['w_qkv'] = stack(lambda: nrm((H, 3 * H))).astype(bf16)
    p['w_out'] = stack(lambda: nrm((H, H))).astype(bf16)
    b_out = stack(lambda: nrm((1, H)))
    p['w1'] = stack(lambda: nrm((H, M))).astype(bf16)
    p['b1'] = stack(lambda: nrm((1, M)))
    p['w2'] = stack(lambda: nrm((M, H))).astype(bf16)
    b_mlp2 = stack(lambda: nrm((1, H)))

    ln1_g = jnp.ones((L, 1, H), jnp.float32)
    ln1_b = jnp.zeros((L, 1, H), jnp.float32)
    ln2_g = jnp.ones((L, 1, H), jnp.float32)
    ln2_b = jnp.zeros((L, 1, H), jnp.float32)
    # Pack all per-layer (1, H) constants into one (L, 6, H) tensor:
    # rows = [ln1_g, ln1_b, b_out, ln2_g, ln2_b, b_mlp2].
    p['consts_h'] = jnp.concatenate([ln1_g, ln1_b, b_out, ln2_g, ln2_b, b_mlp2],
                                    axis=1)

    # Final LayerNorm packed as (2, H): [gamma; beta].
    p['ln_f'] = jnp.concatenate([jnp.ones((1, H), jnp.float32),
                                 jnp.zeros((1, H), jnp.float32)], axis=0)

    # ---- layer-invariant attention masks (hoisted out of the kernel) ----
    dh = H // NUM_HEADS
    exp_head = jnp.arange(HR)[:, None] // ROWS              # head of expanded row
    feat_head = jnp.arange(H)[None, :] // dh
    p['head_mask'] = (exp_head == feat_head).astype(bf16)                 # (HR, H)
    q_batch = jnp.arange(ROWS)[:, None] // N_PATCHES
    k_batch = (jnp.arange(HR)[None, :] % ROWS) // N_PATCHES
    p['batch_mask'] = jnp.where(q_batch == k_batch, 0.0, -1e30
                                ).astype(jnp.float32)                     # (R, HR)
    ha = jnp.arange(HR) // ROWS
    p['blk'] = (ha[:, None] == ha[None, :]).astype(jnp.float32)           # (HR, HR)

    # ConvTranspose2d #1 (hidden -> DECONV_CH, k=s=4) as a matmul with columns
    # permuted to (p1, p2, dc) order.  PyTorch weight layout: (Cin, Cout, k, k).
    w_dc1 = nrm((H, DECONV_CH, UP_K, UP_K))
    b_dc1 = nrm((DECONV_CH,))
    p['w_dc1'] = (w_dc1.transpose(0, 2, 3, 1)
                       .reshape(H, DC_COLS).astype(bf16))
    b_dc1_row = jnp.tile(b_dc1, (UP_K * UP_K,))[None, :]                  # (1, 128)

    # ConvTranspose2d #2 (DECONV_CH -> OUT_CH, k=s=4) expanded block-diagonally
    # over the 16 (p1,p2) positions of deconv #1; deconv-1 bias folded through.
    w_dc2 = nrm((DECONV_CH, OUT_CH, UP_K, UP_K))
    b_dc2 = nrm((OUT_CH,))
    w2m = w_dc2.reshape(DECONV_CH, OUT_CH * UP_K * UP_K)                  # (8, 32)
    eye = jnp.eye(UP_K * UP_K, dtype=jnp.float32)                         # (16, 16)
    w_dc2_full = jnp.einsum('ab,dk->adbk', eye, w2m).reshape(DC_COLS, OUT_COLS)
    b_dc2_row = jnp.tile(jnp.repeat(b_dc2, UP_K * UP_K),
                         (UP_K * UP_K,))[None, :]                         # (1, 512)
    p['w_dc2'] = w_dc2_full.astype(bf16)
    p['b_dc2'] = b_dc1_row @ w_dc2_full + b_dc2_row                       # (1, 512)
    return p


# ---------------------------------- main --------------------------------------
if __name__ == "__main__":
    key = jax.random.PRNGKey(0)
    kp, kr, ki = jax.random.split(key, 3)
    params = init_params(kp)

    # complex Fourier-space input, shape (B, H, W)  (ndim == spatial_dims + 1)
    x = (jax.random.normal(kr, (B, IMG, IMG), dtype=jnp.float32)
         + 1j * jax.random.normal(ki, (B, IMG, IMG), dtype=jnp.float32)
         ).astype(jnp.complex64)

    fwd = jax.jit(fourier_space_model)
    out = jax.block_until_ready(fwd(params, x))
    assert out.shape == (B, OUT_CH, IMG, IMG), out.shape
    assert out.dtype == jnp.float32
    assert bool(jnp.all(jnp.isfinite(out)))
    print("KERNEL_OK")
</pallas_src>

<mosaic_0001>
module attributes {stable_mosaic.version = 11 : i64} {
  func.func @_fused_model_kernel(%arg0: memref<8x512xbf16, #tpu.memory_space<vmem>>, %arg1: memref<512x64xbf16, #tpu.memory_space<vmem>>, %arg2: memref<8x64xf32, #tpu.memory_space<vmem>>, %arg3: memref<2x64x192xbf16, #tpu.memory_space<vmem>>, %arg4: memref<2x64x64xbf16, #tpu.memory_space<vmem>>, %arg5: memref<2x64x128xbf16, #tpu.memory_space<vmem>>, %arg6: memref<2x128x64xbf16, #tpu.memory_space<vmem>>, %arg7: memref<2x6x64xf32, #tpu.memory_space<vmem>>, %arg8: memref<2x1x128xf32, #tpu.memory_space<vmem>>, %arg9: memref<32x64xbf16, #tpu.memory_space<vmem>>, %arg10: memref<8x32xf32, #tpu.memory_space<vmem>>, %arg11: memref<32x32xf32, #tpu.memory_space<vmem>>, %arg12: memref<2x64xf32, #tpu.memory_space<vmem>>, %arg13: memref<64x128xbf16, #tpu.memory_space<vmem>>, %arg14: memref<128x512xbf16, #tpu.memory_space<vmem>>, %arg15: memref<1x512xf32, #tpu.memory_space<vmem>>, %arg16: memref<8x512xf32, #tpu.memory_space<vmem>>) attributes {dimension_semantics = [], scalar_prefetch = 0 : i64, scratch_operands = 0 : i64, tpu.core_type = #tpu.core_type<tc>} {
    %c0 = arith.constant 0 : index
    %c0_0 = arith.constant 0 : index
    %0 = vector.load %arg0[%c0, %c0_0] : memref<8x512xbf16, #tpu.memory_space<vmem>>, vector<8x512xbf16>
    %c0_1 = arith.constant 0 : index
    %c0_2 = arith.constant 0 : index
    %1 = vector.load %arg1[%c0_1, %c0_2] : memref<512x64xbf16, #tpu.memory_space<vmem>>, vector<512x64xbf16>
    %cst = arith.constant dense<0.000000e+00> : vector<8x64xf32>
    %2 = tpu.matmul %0, %1, %cst {dimension_numbers = #tpu.dot_dimension_numbers<[1], [0], [0], [1], [0, 0, 1, 1], [], []>} : vector<8x512xbf16>, vector<512x64xbf16>, vector<8x64xf32> -> vector<8x64xf32>
    %c0_3 = arith.constant 0 : index
    %c0_4 = arith.constant 0 : index
    %3 = vector.load %arg2[%c0_3, %c0_4] : memref<8x64xf32, #tpu.memory_space<vmem>>, vector<8x64xf32>
    %4 = arith.addf %2, %3 : vector<8x64xf32>
    %c0_5 = arith.constant 0 : index
    %c0_6 = arith.constant 0 : index
    %5 = vector.load %arg9[%c0_5, %c0_6] : memref<32x64xbf16, #tpu.memory_space<vmem>>, vector<32x64xbf16>
    %c0_7 = arith.constant 0 : index
    %c0_8 = arith.constant 0 : index
    %6 = vector.load %arg10[%c0_7, %c0_8] : memref<8x32xf32, #tpu.memory_space<vmem>>, vector<8x32xf32>
    %c0_9 = arith.constant 0 : index
    %c0_10 = arith.constant 0 : index
    %7 = vector.load %arg11[%c0_9, %c0_10] : memref<32x32xf32, #tpu.memory_space<vmem>>, vector<32x32xf32>
    %c0_11 = arith.constant 0 : index
    %c0_12 = arith.constant 0 : index
    %c0_13 = arith.constant 0 : index
    %8 = vector.load %arg7[%c0_11, %c0_12, %c0_13] : memref<2x6x64xf32, #tpu.memory_space<vmem>>, vector<1x6x64xf32>
    %9 = vector.shape_cast %8 : vector<1x6x64xf32> to vector<6x64xf32>
    %10 = vector.extract_strided_slice %9 {offsets = [0, 0], sizes = [1, 64], strides = [1, 1]} : vector<6x64xf32> to vector<1x64xf32>
    %11 = vector.extract_strided_slice %9 {offsets = [1, 0], sizes = [1, 64], strides = [1, 1]} : vector<6x64xf32> to vector<1x64xf32>
    %12 = vector.extract_strided_slice %9 {offsets = [2, 0], sizes = [1, 64], strides = [1, 1]} : vector<6x64xf32> to vector<1x64xf32>
    %13 = vector.extract_strided_slice %9 {offsets = [3, 0], sizes = [1, 64], strides = [1, 1]} : vector<6x64xf32> to vector<1x64xf32>
    %14 = vector.extract_strided_slice %9 {offsets = [4, 0], sizes = [1, 64], strides = [1, 1]} : vector<6x64xf32> to vector<1x64xf32>
    %15 = vector.extract_strided_slice %9 {offsets = [5, 0], sizes = [1, 64], strides = [1, 1]} : vector<6x64xf32> to vector<1x64xf32>
    %cst_14 = arith.constant dense<0.000000e+00> : vector<8xf32>
    %16 = vector.multi_reduction <add>, %4, %cst_14 [1] : vector<8x64xf32> to vector<8xf32>
    %17 = vector.shape_cast %16 : vector<8xf32> to vector<8x1xf32>
    %cst_15 = arith.constant 6.400000e+01 : f32
    %18 = vector.broadcast %cst_15 : f32 to vector<8x1xf32>
    %19 = arith.divf %17, %18 : vector<8x1xf32>
    %20 = vector.broadcast %19 : vector<8x1xf32> to vector<8x64xf32>
    %21 = arith.subf %4, %20 : vector<8x64xf32>
    %22 = arith.mulf %21, %21 : vector<8x64xf32>
    %cst_16 = arith.constant dense<0.000000e+00> : vector<8xf32>
    %23 = vector.multi_reduction <add>, %22, %cst_16 [1] : vector<8x64xf32> to vector<8xf32>
    %24 = vector.shape_cast %23 : vector<8xf32> to vector<8x1xf32>
    %cst_17 = arith.constant 6.400000e+01 : f32
    %25 = vector.broadcast %cst_17 : f32 to vector<8x1xf32>
    %26 = arith.divf %24, %25 : vector<8x1xf32>
    %27 = vector.broadcast %19 : vector<8x1xf32> to vector<8x64xf32>
    %28 = arith.subf %4, %27 : vector<8x64xf32>
    %cst_18 = arith.constant 9.99999974E-6 : f32
    %29 = vector.broadcast %cst_18 : f32 to vector<8x1xf32>
    %30 = arith.addf %26, %29 : vector<8x1xf32>
    %31 = math.rsqrt %30 : vector<8x1xf32>
    %32 = vector.broadcast %31 : vector<8x1xf32> to vector<8x64xf32>
    %33 = arith.mulf %28, %32 : vector<8x64xf32>
    %34 = vector.broadcast %10 : vector<1x64xf32> to vector<8x64xf32>
    %35 = arith.mulf %33, %34 : vector<8x64xf32>
    %36 = vector.broadcast %11 : vector<1x64xf32> to vector<8x64xf32>
    %37 = arith.addf %35, %36 : vector<8x64xf32>
    %38 = arith.truncf %37 : vector<8x64xf32> to vector<8x64xbf16>
    %c0_19 = arith.constant 0 : index
    %c0_20 = arith.constant 0 : index
    %c0_21 = arith.constant 0 : index
    %39 = vector.load %arg3[%c0_19, %c0_20, %c0_21] : memref<2x64x192xbf16, #tpu.memory_space<vmem>>, vector<1x64x192xbf16>
    %40 = vector.shape_cast %39 : vector<1x64x192xbf16> to vector<64x192xbf16>
    %cst_22 = arith.constant dense<0.000000e+00> : vector<8x192xf32>
    %41 = tpu.matmul %38, %40, %cst_22 {dimension_numbers = #tpu.dot_dimension_numbers<[1], [0], [0], [1], [0, 0, 1, 1], [], []>} : vector<8x64xbf16>, vector<64x192xbf16>, vector<8x192xf32> -> vector<8x192xf32>
    %42 = vector.extract_strided_slice %41 {offsets = [0, 0], sizes = [8, 64], strides = [1, 1]} : vector<8x192xf32> to vector<8x64xf32>
    %43 = arith.truncf %42 : vector<8x64xf32> to vector<8x64xbf16>
    %44 = vector.extract_strided_slice %41 {offsets = [0, 64], sizes = [8, 64], strides = [1, 1]} : vector<8x192xf32> to vector<8x64xf32>
    %45 = arith.truncf %44 : vector<8x64xf32> to vector<8x64xbf16>
    %46 = vector.extract_strided_slice %41 {offsets = [0, 128], sizes = [8, 64], strides = [1, 1]} : vector<8x192xf32> to vector<8x64xf32>
    %47 = arith.truncf %46 : vector<8x64xf32> to vector<8x64xbf16>
    %48 = tpu.concatenate %45, %45, %45, %45 in 0 : vector<8x64xbf16>, vector<8x64xbf16>, vector<8x64xbf16>, vector<8x64xbf16> -> vector<32x64xbf16>
    %49 = arith.mulf %48, %5 : vector<32x64xbf16>
    %50 = tpu.concatenate %47, %47, %47, %47 in 0 : vector<8x64xbf16>, vector<8x64xbf16>, vector<8x64xbf16>, vector<8x64xbf16> -> vector<32x64xbf16>
    %51 = arith.mulf %50, %5 : vector<32x64xbf16>
    %cst_23 = arith.constant dense<0.000000e+00> : vector<8x32xf32>
    %52 = tpu.matmul %43, %49, %cst_23 {dimension_numbers = #tpu.dot_dimension_numbers<[1], [1], [0], [0], [0, 0, 1, 0], [], []>} : vector<8x64xbf16>, vector<32x64xbf16>, vector<8x32xf32> -> vector<8x32xf32>
    %cst_24 = arith.constant 2.500000e-01 : f32
    %53 = vector.broadcast %cst_24 : f32 to vector<8x32xf32>
    %54 = arith.mulf %52, %53 : vector<8x32xf32>
    %55 = arith.addf %54, %6 : vector<8x32xf32>
    %cst_25 = arith.constant dense<0xFF800000> : vector<8xf32>
    %56 = vector.multi_reduction <maximumf>, %55, %cst_25 [1] : vector<8x32xf32> to vector<8xf32>
    %57 = vector.shape_cast %56 : vector<8xf32> to vector<8x1xf32>
    %58 = vector.broadcast %57 : vector<8x1xf32> to vector<8x32xf32>
    %59 = arith.subf %55, %58 : vector<8x32xf32>
    %60 = math.exp %59 : vector<8x32xf32>
    %cst_26 = arith.constant dense<0.000000e+00> : vector<8x32xf32>
    %61 = tpu.matmul %60, %7, %cst_26 {dimension_numbers = #tpu.dot_dimension_numbers<[1], [0], [0], [1], [0, 0, 1, 1], [], []>} : vector<8x32xf32>, vector<32x32xf32>, vector<8x32xf32> -> vector<8x32xf32>
    %cst_27 = arith.constant 1.000000e-30 : f32
    %62 = vector.broadcast %cst_27 : f32 to vector<8x32xf32>
    %63 = arith.maximumf %61, %62 : vector<8x32xf32>
    %64 = tpu.reciprocal %63 {approx = true} : vector<8x32xf32> -> vector<8x32xf32>
    %65 = arith.mulf %60, %64 : vector<8x32xf32>
    %66 = arith.truncf %65 : vector<8x32xf32> to vector<8x32xbf16>
    %cst_28 = arith.constant dense<0.000000e+00> : vector<8x64xf32>
    %67 = tpu.matmul %66, %51, %cst_28 {dimension_numbers = #tpu.dot_dimension_numbers<[1], [0], [0], [1], [0, 0, 1, 1], [], []>} : vector<8x32xbf16>, vector<32x64xbf16>, vector<8x64xf32> -> vector<8x64xf32>
    %68 = arith.truncf %67 : vector<8x64xf32> to vector<8x64xbf16>
    %c0_29 = arith.constant 0 : index
    %c0_30 = arith.constant 0 : index
    %c0_31 = arith.constant 0 : index
    %69 = vector.load %arg4[%c0_29, %c0_30, %c0_31] : memref<2x64x64xbf16, #tpu.memory_space<vmem>>, vector<1x64x64xbf16>
    %70 = vector.shape_cast %69 : vector<1x64x64xbf16> to vector<64x64xbf16>
    %cst_32 = arith.constant dense<0.000000e+00> : vector<8x64xf32>
    %71 = tpu.matmul %68, %70, %cst_32 {dimension_numbers = #tpu.dot_dimension_numbers<[1], [0], [0], [1], [0, 0, 1, 1], [], []>} : vector<8x64xbf16>, vector<64x64xbf16>, vector<8x64xf32> -> vector<8x64xf32>
    %72 = vector.broadcast %12 : vector<1x64xf32> to vector<8x64xf32>
    %73 = arith.addf %71, %72 : vector<8x64xf32>
    %74 = arith.addf %4, %73 : vector<8x64xf32>
    %cst_33 = arith.constant dense<0.000000e+00> : vector<8xf32>
    %75 = vector.multi_reduction <add>, %74, %cst_33 [1] : vector<8x64xf32> to vector<8xf32>
    %76 = vector.shape_cast %75 : vector<8xf32> to vector<8x1xf32>
    %cst_34 = arith.constant 6.400000e+01 : f32
    %77 = vector.broadcast %cst_34 : f32 to vector<8x1xf32>
    %78 = arith.divf %76, %77 : vector<8x1xf32>
    %79 = vector.broadcast %78 : vector<8x1xf32> to vector<8x64xf32>
    %80 = arith.subf %74, %79 : vector<8x64xf32>
    %81 = arith.mulf %80, %80 : vector<8x64xf32>
    %cst_35 = arith.constant dense<0.000000e+00> : vector<8xf32>
    %82 = vector.multi_reduction <add>, %81, %cst_35 [1] : vector<8x64xf32> to vector<8xf32>
    %83 = vector.shape_cast %82 : vector<8xf32> to vector<8x1xf32>
    %cst_36 = arith.constant 6.400000e+01 : f32
    %84 = vector.broadcast %cst_36 : f32 to vector<8x1xf32>
    %85 = arith.divf %83, %84 : vector<8x1xf32>
    %86 = vector.broadcast %78 : vector<8x1xf32> to vector<8x64xf32>
    %87 = arith.subf %74, %86 : vector<8x64xf32>
    %cst_37 = arith.constant 9.99999974E-6 : f32
    %88 = vector.broadcast %cst_37 : f32 to vector<8x1xf32>
    %89 = arith.addf %85, %88 : vector<8x1xf32>
    %90 = math.rsqrt %89 : vector<8x1xf32>
    %91 = vector.broadcast %90 : vector<8x1xf32> to vector<8x64xf32>
    %92 = arith.mulf %87, %91 : vector<8x64xf32>
    %93 = vector.broadcast %13 : vector<1x64xf32> to vector<8x64xf32>
    %94 = arith.mulf %92, %93 : vector<8x64xf32>
    %95 = vector.broadcast %14 : vector<1x64xf32> to vector<8x64xf32>
    %96 = arith.addf %94, %95 : vector<8x64xf32>
    %97 = arith.truncf %96 : vector<8x64xf32> to vector<8x64xbf16>
    %c0_38 = arith.constant 0 : index
    %c0_39 = arith.constant 0 : index
    %c0_40 = arith.constant 0 : index
    %98 = vector.load %arg5[%c0_38, %c0_39, %c0_40] : memref<2x64x128xbf16, #tpu.memory_space<vmem>>, vector<1x64x128xbf16>
    %99 = vector.shape_cast %98 : vector<1x64x128xbf16> to vector<64x128xbf16>
    %cst_41 = arith.constant dense<0.000000e+00> : vector<8x128xf32>
    %100 = tpu.matmul %97, %99, %cst_41 {dimension_numbers = #tpu.dot_dimension_numbers<[1], [0], [0], [1], [0, 0, 1, 1], [], []>} : vector<8x64xbf16>, vector<64x128xbf16>, vector<8x128xf32> -> vector<8x128xf32>
    %c0_42 = arith.constant 0 : index
    %c0_43 = arith.constant 0 : index
    %c0_44 = arith.constant 0 : index
    %101 = vector.load %arg8[%c0_42, %c0_43, %c0_44] : memref<2x1x128xf32, #tpu.memory_space<vmem>>, vector<1x1x128xf32>
    %102 = vector.shape_cast %101 : vector<1x1x128xf32> to vector<1x128xf32>
    %103 = vector.broadcast %102 : vector<1x128xf32> to vector<8x128xf32>
    %104 = arith.addf %100, %103 : vector<8x128xf32>
    %105 = arith.mulf %104, %104 : vector<8x128xf32>
    %106 = arith.mulf %104, %105 : vector<8x128xf32>
    %cst_45 = arith.constant 4.471500e-02 : f32
    %107 = vector.broadcast %cst_45 : f32 to vector<8x128xf32>
    %108 = arith.mulf %107, %106 : vector<8x128xf32>
    %109 = arith.addf %104, %108 : vector<8x128xf32>
    %cst_46 = arith.constant 0.797884583 : f32
    %110 = vector.broadcast %cst_46 : f32 to vector<8x128xf32>
    %111 = arith.mulf %110, %109 : vector<8x128xf32>
    %112 = math.tanh %111 : vector<8x128xf32>
    %cst_47 = arith.constant 1.000000e+00 : f32
    %113 = vector.broadcast %cst_47 : f32 to vector<8x128xf32>
    %114 = arith.addf %113, %112 : vector<8x128xf32>
    %cst_48 = arith.constant 5.000000e-01 : f32
    %115 = vector.broadcast %cst_48 : f32 to vector<8x128xf32>
    %116 = arith.mulf %115, %114 : vector<8x128xf32>
    %117 = arith.mulf %104, %116 : vector<8x128xf32>
    %118 = arith.truncf %117 : vector<8x128xf32> to vector<8x128xbf16>
    %c0_49 = arith.constant 0 : index
    %c0_50 = arith.constant 0 : index
    %c0_51 = arith.constant 0 : index
    %119 = vector.load %arg6[%c0_49, %c0_50, %c0_51] : memref<2x128x64xbf16, #tpu.memory_space<vmem>>, vector<1x128x64xbf16>
    %120 = vector.shape_cast %119 : vector<1x128x64xbf16> to vector<128x64xbf16>
    %cst_52 = arith.constant dense<0.000000e+00> : vector<8x64xf32>
    %121 = tpu.matmul %118, %120, %cst_52 {dimension_numbers = #tpu.dot_dimension_numbers<[1], [0], [0], [1], [0, 0, 1, 1], [], []>} : vector<8x128xbf16>, vector<128x64xbf16>, vector<8x64xf32> -> vector<8x64xf32>
    %122 = vector.broadcast %15 : vector<1x64xf32> to vector<8x64xf32>
    %123 = arith.addf %121, %122 : vector<8x64xf32>
    %124 = arith.addf %74, %123 : vector<8x64xf32>
    %c1 = arith.constant 1 : index
    %c0_53 = arith.constant 0 : index
    %c0_54 = arith.constant 0 : index
    %125 = vector.load %arg7[%c1, %c0_53, %c0_54] : memref<2x6x64xf32, #tpu.memory_space<vmem>>, vector<1x6x64xf32>
    %126 = vector.shape_cast %125 : vector<1x6x64xf32> to vector<6x64xf32>
    %127 = vector.extract_strided_slice %126 {offsets = [0, 0], sizes = [1, 64], strides = [1, 1]} : vector<6x64xf32> to vector<1x64xf32>
    %128 = vector.extract_strided_slice %126 {offsets = [1, 0], sizes = [1, 64], strides = [1, 1]} : vector<6x64xf32> to vector<1x64xf32>
    %129 = vector.extract_strided_slice %126 {offsets = [2, 0], sizes = [1, 64], strides = [1, 1]} : vector<6x64xf32> to vector<1x64xf32>
    %130 = vector.extract_strided_slice %126 {offsets = [3, 0], sizes = [1, 64], strides = [1, 1]} : vector<6x64xf32> to vector<1x64xf32>
    %131 = vector.extract_strided_slice %126 {offsets = [4, 0], sizes = [1, 64], strides = [1, 1]} : vector<6x64xf32> to vector<1x64xf32>
    %132 = vector.extract_strided_slice %126 {offsets = [5, 0], sizes = [1, 64], strides = [1, 1]} : vector<6x64xf32> to vector<1x64xf32>
    %cst_55 = arith.constant dense<0.000000e+00> : vector<8xf32>
    %133 = vector.multi_reduction <add>, %124, %cst_55 [1] : vector<8x64xf32> to vector<8xf32>
    %134 = vector.shape_cast %133 : vector<8xf32> to vector<8x1xf32>
    %cst_56 = arith.constant 6.400000e+01 : f32
    %135 = vector.broadcast %cst_56 : f32 to vector<8x1xf32>
    %136 = arith.divf %134, %135 : vector<8x1xf32>
    %137 = vector.broadcast %136 : vector<8x1xf32> to vector<8x64xf32>
    %138 = arith.subf %124, %137 : vector<8x64xf32>
    %139 = arith.mulf %138, %138 : vector<8x64xf32>
    %cst_57 = arith.constant dense<0.000000e+00> : vector<8xf32>
    %140 = vector.multi_reduction <add>, %139, %cst_57 [1] : vector<8x64xf32> to vector<8xf32>
    %141 = vector.shape_cast %140 : vector<8xf32> to vector<8x1xf32>
    %cst_58 = arith.constant 6.400000e+01 : f32
    %142 = vector.broadcast %cst_58 : f32 to vector<8x1xf32>
    %143 = arith.divf %141, %142 : vector<8x1xf32>
    %144 = vector.broadcast %136 : vector<8x1xf32> to vector<8x64xf32>
    %145 = arith.subf %124, %144 : vector<8x64xf32>
    %cst_59 = arith.constant 9.99999974E-6 : f32
    %146 = vector.broadcast %cst_59 : f32 to vector<8x1xf32>
    %147 = arith.addf %143, %146 : vector<8x1xf32>
    %148 = math.rsqrt %147 : vector<8x1xf32>
    %149 = vector.broadcast %148 : vector<8x1xf32> to vector<8x64xf32>
    %150 = arith.mulf %145, %149 : vector<8x64xf32>
    %151 = vector.broadcast %127 : vector<1x64xf32> to vector<8x64xf32>
    %152 = arith.mulf %150, %151 : vector<8x64xf32>
    %153 = vector.broadcast %128 : vector<1x64xf32> to vector<8x64xf32>
    %154 = arith.addf %152, %153 : vector<8x64xf32>
    %155 = arith.truncf %154 : vector<8x64xf32> to vector<8x64xbf16>
    %c1_60 = arith.constant 1 : index
    %c0_61 = arith.constant 0 : index
    %c0_62 = arith.constant 0 : index
    %156 = vector.load %arg3[%c1_60, %c0_61, %c0_62] : memref<2x64x192xbf16, #tpu.memory_space<vmem>>, vector<1x64x192xbf16>
    %157 = vector.shape_cast %156 : vector<1x64x192xbf16> to vector<64x192xbf16>
    %cst_63 = arith.constant dense<0.000000e+00> : vector<8x192xf32>
    %158 = tpu.matmul %155, %157, %cst_63 {dimension_numbers = #tpu.dot_dimension_numbers<[1], [0], [0], [1], [0, 0, 1, 1], [], []>} : vector<8x64xbf16>, vector<64x192xbf16>, vector<8x192xf32> -> vector<8x192xf32>
    %159 = vector.extract_strided_slice %158 {offsets = [0, 0], sizes = [8, 64], strides = [1, 1]} : vector<8x192xf32> to vector<8x64xf32>
    %160 = arith.truncf %159 : vector<8x64xf32> to vector<8x64xbf16>
    %161 = vector.extract_strided_slice %158 {offsets = [0, 64], sizes = [8, 64], strides = [1, 1]} : vector<8x192xf32> to vector<8x64xf32>
    %162 = arith.truncf %161 : vector<8x64xf32> to vector<8x64xbf16>
    %163 = vector.extract_strided_slice %158 {offsets = [0, 128], sizes = [8, 64], strides = [1, 1]} : vector<8x192xf32> to vector<8x64xf32>
    %164 = arith.truncf %163 : vector<8x64xf32> to vector<8x64xbf16>
    %165 = tpu.concatenate %162, %162, %162, %162 in 0 : vector<8x64xbf16>, vector<8x64xbf16>, vector<8x64xbf16>, vector<8x64xbf16> -> vector<32x64xbf16>
    %166 = arith.mulf %165, %5 : vector<32x64xbf16>
    %167 = tpu.concatenate %164, %164, %164, %164 in 0 : vector<8x64xbf16>, vector<8x64xbf16>, vector<8x64xbf16>, vector<8x64xbf16> -> vector<32x64xbf16>
    %168 = arith.mulf %167, %5 : vector<32x64xbf16>
    %cst_64 = arith.constant dense<0.000000e+00> : vector<8x32xf32>
    %169 = tpu.matmul %160, %166, %cst_64 {dimension_numbers = #tpu.dot_dimension_numbers<[1], [1], [0], [0], [0, 0, 1, 0], [], []>} : vector<8x64xbf16>, vector<32x64xbf16>, vector<8x32xf32> -> vector<8x32xf32>
    %cst_65 = arith.constant 2.500000e-01 : f32
    %170 = vector.broadcast %cst_65 : f32 to vector<8x32xf32>
    %171 = arith.mulf %169, %170 : vector<8x32xf32>
    %172 = arith.addf %171, %6 : vector<8x32xf32>
    %cst_66 = arith.constant dense<0xFF800000> : vector<8xf32>
    %173 = vector.multi_reduction <maximumf>, %172, %cst_66 [1] : vector<8x32xf32> to vector<8xf32>
    %174 = vector.shape_cast %173 : vector<8xf32> to vector<8x1xf32>
    %175 = vector.broadcast %174 : vector<8x1xf32> to vector<8x32xf32>
    %176 = arith.subf %172, %175 : vector<8x32xf32>
    %177 = math.exp %176 : vector<8x32xf32>
    %cst_67 = arith.constant dense<0.000000e+00> : vector<8x32xf32>
    %178 = tpu.matmul %177, %7, %cst_67 {dimension_numbers = #tpu.dot_dimension_numbers<[1], [0], [0], [1], [0, 0, 1, 1], [], []>} : vector<8x32xf32>, vector<32x32xf32>, vector<8x32xf32> -> vector<8x32xf32>
    %cst_68 = arith.constant 1.000000e-30 : f32
    %179 = vector.broadcast %cst_68 : f32 to vector<8x32xf32>
    %180 = arith.maximumf %178, %179 : vector<8x32xf32>
    %181 = tpu.reciprocal %180 {approx = true} : vector<8x32xf32> -> vector<8x32xf32>
    %182 = arith.mulf %177, %181 : vector<8x32xf32>
    %183 = arith.truncf %182 : vector<8x32xf32> to vector<8x32xbf16>
    %cst_69 = arith.constant dense<0.000000e+00> : vector<8x64xf32>
    %184 = tpu.matmul %183, %168, %cst_69 {dimension_numbers = #tpu.dot_dimension_numbers<[1], [0], [0], [1], [0, 0, 1, 1], [], []>} : vector<8x32xbf16>, vector<32x64xbf16>, vector<8x64xf32> -> vector<8x64xf32>
    %185 = arith.truncf %184 : vector<8x64xf32> to vector<8x64xbf16>
    %c1_70 = arith.constant 1 : index
    %c0_71 = arith.constant 0 : index
    %c0_72 = arith.constant 0 : index
    %186 = vector.load %arg4[%c1_70, %c0_71, %c0_72] : memref<2x64x64xbf16, #tpu.memory_space<vmem>>, vector<1x64x64xbf16>
    %187 = vector.shape_cast %186 : vector<1x64x64xbf16> to vector<64x64xbf16>
    %cst_73 = arith.constant dense<0.000000e+00> : vector<8x64xf32>
    %188 = tpu.matmul %185, %187, %cst_73 {dimension_numbers = #tpu.dot_dimension_numbers<[1], [0], [0], [1], [0, 0, 1, 1], [], []>} : vector<8x64xbf16>, vector<64x64xbf16>, vector<8x64xf32> -> vector<8x64xf32>
    %189 = vector.broadcast %129 : vector<1x64xf32> to vector<8x64xf32>
    %190 = arith.addf %188, %189 : vector<8x64xf32>
    %191 = arith.addf %124, %190 : vector<8x64xf32>
    %cst_74 = arith.constant dense<0.000000e+00> : vector<8xf32>
    %192 = vector.multi_reduction <add>, %191, %cst_74 [1] : vector<8x64xf32> to vector<8xf32>
    %193 = vector.shape_cast %192 : vector<8xf32> to vector<8x1xf32>
    %cst_75 = arith.constant 6.400000e+01 : f32
    %194 = vector.broadcast %cst_75 : f32 to vector<8x1xf32>
    %195 = arith.divf %193, %194 : vector<8x1xf32>
    %196 = vector.broadcast %195 : vector<8x1xf32> to vector<8x64xf32>
    %197 = arith.subf %191, %196 : vector<8x64xf32>
    %198 = arith.mulf %197, %197 : vector<8x64xf32>
    %cst_76 = arith.constant dense<0.000000e+00> : vector<8xf32>
    %199 = vector.multi_reduction <add>, %198, %cst_76 [1] : vector<8x64xf32> to vector<8xf32>
    %200 = vector.shape_cast %199 : vector<8xf32> to vector<8x1xf32>
    %cst_77 = arith.constant 6.400000e+01 : f32
    %201 = vector.broadcast %cst_77 : f32 to vector<8x1xf32>
    %202 = arith.divf %200, %201 : vector<8x1xf32>
    %203 = vector.broadcast %195 : vector<8x1xf32> to vector<8x64xf32>
    %204 = arith.subf %191, %203 : vector<8x64xf32>
    %cst_78 = arith.constant 9.99999974E-6 : f32
    %205 = vector.broadcast %cst_78 : f32 to vector<8x1xf32>
    %206 = arith.addf %202, %205 : vector<8x1xf32>
    %207 = math.rsqrt %206 : vector<8x1xf32>
    %208 = vector.broadcast %207 : vector<8x1xf32> to vector<8x64xf32>
    %209 = arith.mulf %204, %208 : vector<8x64xf32>
    %210 = vector.broadcast %130 : vector<1x64xf32> to vector<8x64xf32>
    %211 = arith.mulf %209, %210 : vector<8x64xf32>
    %212 = vector.broadcast %131 : vector<1x64xf32> to vector<8x64xf32>
    %213 = arith.addf %211, %212 : vector<8x64xf32>
    %214 = arith.truncf %213 : vector<8x64xf32> to vector<8x64xbf16>
    %c1_79 = arith.constant 1 : index
    %c0_80 = arith.constant 0 : index
    %c0_81 = arith.constant 0 : index
    %215 = vector.load %arg5[%c1_79, %c0_80, %c0_81] : memref<2x64x128xbf16, #tpu.memory_space<vmem>>, vector<1x64x128xbf16>
    %216 = vector.shape_cast %215 : vector<1x64x128xbf16> to vector<64x128xbf16>
    %cst_82 = arith.constant dense<0.000000e+00> : vector<8x128xf32>
    %217 = tpu.matmul %214, %216, %cst_82 {dimension_numbers = #tpu.dot_dimension_numbers<[1], [0], [0], [1], [0, 0, 1, 1], [], []>} : vector<8x64xbf16>, vector<64x128xbf16>, vector<8x128xf32> -> vector<8x128xf32>
    %c1_83 = arith.constant 1 : index
    %c0_84 = arith.constant 0 : index
    %c0_85 = arith.constant 0 : index
    %218 = vector.load %arg8[%c1_83, %c0_84, %c0_85] : memref<2x1x128xf32, #tpu.memory_space<vmem>>, vector<1x1x128xf32>
    %219 = vector.shape_cast %218 : vector<1x1x128xf32> to vector<1x128xf32>
    %220 = vector.broadcast %219 : vector<1x128xf32> to vector<8x128xf32>
    %221 = arith.addf %217, %220 : vector<8x128xf32>
    %222 = arith.mulf %221, %221 : vector<8x128xf32>
    %223 = arith.mulf %221, %222 : vector<8x128xf32>
    %cst_86 = arith.constant 4.471500e-02 : f32
    %224 = vector.broadcast %cst_86 : f32 to vector<8x128xf32>
    %225 = arith.mulf %224, %223 : vector<8x128xf32>
    %226 = arith.addf %221, %225 : vector<8x128xf32>
    %cst_87 = arith.constant 0.797884583 : f32
    %227 = vector.broadcast %cst_87 : f32 to vector<8x128xf32>
    %228 = arith.mulf %227, %226 : vector<8x128xf32>
    %229 = math.tanh %228 : vector<8x128xf32>
    %cst_88 = arith.constant 1.000000e+00 : f32
    %230 = vector.broadcast %cst_88 : f32 to vector<8x128xf32>
    %231 = arith.addf %230, %229 : vector<8x128xf32>
    %cst_89 = arith.constant 5.000000e-01 : f32
    %232 = vector.broadcast %cst_89 : f32 to vector<8x128xf32>
    %233 = arith.mulf %232, %231 : vector<8x128xf32>
    %234 = arith.mulf %221, %233 : vector<8x128xf32>
    %235 = arith.truncf %234 : vector<8x128xf32> to vector<8x128xbf16>
    %c1_90 = arith.constant 1 : index
    %c0_91 = arith.constant 0 : index
    %c0_92 = arith.constant 0 : index
    %236 = vector.load %arg6[%c1_90, %c0_91, %c0_92] : memref<2x128x64xbf16, #tpu.memory_space<vmem>>, vector<1x128x64xbf16>
    %237 = vector.shape_cast %236 : vector<1x128x64xbf16> to vector<128x64xbf16>
    %cst_93 = arith.constant dense<0.000000e+00> : vector<8x64xf32>
    %238 = tpu.matmul %235, %237, %cst_93 {dimension_numbers = #tpu.dot_dimension_numbers<[1], [0], [0], [1], [0, 0, 1, 1], [], []>} : vector<8x128xbf16>, vector<128x64xbf16>, vector<8x64xf32> -> vector<8x64xf32>
    %239 = vector.broadcast %132 : vector<1x64xf32> to vector<8x64xf32>
    %240 = arith.addf %238, %239 : vector<8x64xf32>
    %241 = arith.addf %191, %240 : vector<8x64xf32>
    %c0_94 = arith.constant 0 : index
    %c0_95 = arith.constant 0 : index
    %242 = vector.load %arg12[%c0_94, %c0_95] : memref<2x64xf32, #tpu.memory_space<vmem>>, vector<2x64xf32>
    %243 = vector.extract_strided_slice %242 {offsets = [0, 0], sizes = [1, 64], strides = [1, 1]} : vector<2x64xf32> to vector<1x64xf32>
    %244 = vector.extract_strided_slice %242 {offsets = [1, 0], sizes = [1, 64], strides = [1, 1]} : vector<2x64xf32> to vector<1x64xf32>
    %cst_96 = arith.constant dense<0.000000e+00> : vector<8xf32>
    %245 = vector.multi_reduction <add>, %241, %cst_96 [1] : vector<8x64xf32> to vector<8xf32>
    %246 = vector.shape_cast %245 : vector<8xf32> to vector<8x1xf32>
    %cst_97 = arith.constant 6.400000e+01 : f32
    %247 = vector.broadcast %cst_97 : f32 to vector<8x1xf32>
    %248 = arith.divf %246, %247 : vector<8x1xf32>
    %249 = vector.broadcast %248 : vector<8x1xf32> to vector<8x64xf32>
    %250 = arith.subf %241, %249 : vector<8x64xf32>
    %251 = arith.mulf %250, %250 : vector<8x64xf32>
    %cst_98 = arith.constant dense<0.000000e+00> : vector<8xf32>
    %252 = vector.multi_reduction <add>, %251, %cst_98 [1] : vector<8x64xf32> to vector<8xf32>
    %253 = vector.shape_cast %252 : vector<8xf32> to vector<8x1xf32>
    %cst_99 = arith.constant 6.400000e+01 : f32
    %254 = vector.broadcast %cst_99 : f32 to vector<8x1xf32>
    %255 = arith.divf %253, %254 : vector<8x1xf32>
    %256 = vector.broadcast %248 : vector<8x1xf32> to vector<8x64xf32>
    %257 = arith.subf %241, %256 : vector<8x64xf32>
    %cst_100 = arith.constant 9.99999974E-6 : f32
    %258 = vector.broadcast %cst_100 : f32 to vector<8x1xf32>
    %259 = arith.addf %255, %258 : vector<8x1xf32>
    %260 = math.rsqrt %259 : vector<8x1xf32>
    %261 = vector.broadcast %260 : vector<8x1xf32> to vector<8x64xf32>
    %262 = arith.mulf %257, %261 : vector<8x64xf32>
    %263 = vector.broadcast %243 : vector<1x64xf32> to vector<8x64xf32>
    %264 = arith.mulf %262, %263 : vector<8x64xf32>
    %265 = vector.broadcast %244 : vector<1x64xf32> to vector<8x64xf32>
    %266 = arith.addf %264, %265 : vector<8x64xf32>
    %267 = arith.truncf %266 : vector<8x64xf32> to vector<8x64xbf16>
    %c0_101 = arith.constant 0 : index
    %c0_102 = arith.constant 0 : index
    %268 = vector.load %arg13[%c0_101, %c0_102] : memref<64x128xbf16, #tpu.memory_space<vmem>>, vector<64x128xbf16>
    %cst_103 = arith.constant dense<0.000000e+00> : vector<8x128xf32>
    %269 = tpu.matmul %267, %268, %cst_103 {dimension_numbers = #tpu.dot_dimension_numbers<[1], [0], [0], [1], [0, 0, 1, 1], [], []>} : vector<8x64xbf16>, vector<64x128xbf16>, vector<8x128xf32> -> vector<8x128xf32>
    %270 = arith.truncf %269 : vector<8x128xf32> to vector<8x128xbf16>
    %c0_104 = arith.constant 0 : index
    %c0_105 = arith.constant 0 : index
    %271 = vector.load %arg14[%c0_104, %c0_105] : memref<128x512xbf16, #tpu.memory_space<vmem>>, vector<128x512xbf16>
    %cst_106 = arith.constant dense<0.000000e+00> : vector<8x512xf32>
    %272 = tpu.matmul %270, %271, %cst_106 {dimension_numbers = #tpu.dot_dimension_numbers<[1], [0], [0], [1], [0, 0, 1, 1], [], []>} : vector<8x128xbf16>, vector<128x512xbf16>, vector<8x512xf32> -> vector<8x512xf32>
    %c0_107 = arith.constant 0 : index
    %c0_108 = arith.constant 0 : index
    %273 = vector.load %arg15[%c0_107, %c0_108] : memref<1x512xf32, #tpu.memory_space<vmem>>, vector<1x512xf32>
    %274 = vector.broadcast %273 : vector<1x512xf32> to vector<8x512xf32>
    %275 = arith.addf %272, %274 : vector<8x512xf32>
    %c0_109 = arith.constant 0 : index
    %c0_110 = arith.constant 0 : index
    %276 = vector.load %arg16[%c0_109, %c0_110] : memref<8x512xf32, #tpu.memory_space<vmem>>, vector<8x512xf32>
    tpu.vector_store %arg16[%c0_109, %c0_110], %275 {strides = array<i32>} : memref<8x512xf32, #tpu.memory_space<vmem>>, vector<8x512xf32>,
    return
  }
}

</mosaic_0001>

<bundles_post_ra>
// kernel: custom-call.1
= control target key start
LH: loop header
LB: loop body
LE: loop exit
PB: predicated region body
PF: predicated region fallthrough
CT: control target
= control target key end

     0   :  { %s59_s0 = inlined_call_operand.hbm [shape: c64[2,32,32], index: 0, kind: input, shape index: {}]   ;;  %s60_s1 = inlined_call_operand.vmem [shape: f32[2,32,32], index: 1, kind: output, shape index: {}]  }
   0x1   :  { %s2_s8 = scalar_lea.hbm %s59_s0, 1024 }
   0x2   :  { %3 = vsyncpa [#allocation0], 0  ;;  %s4_s11 = sshll.u32 %s60_s1, 4  ;;  %s34_s14 = scalar_lea.hbm %s59_s0, 2048  ;;  %s5_s11 = int_to_ptr.vmem [resolvable:$true] %s4_s11 }
   0x3   :  { %p11_p0 = scmp.ne.s32.totalorder %s2_s8, %s34_s14  ;;  %p13_p1 = scmp.lt.u32.totalorder %s2_s8, %s59_s0 }
   0x4   :  { %p14_p2 = scmp.lt.u32.totalorder %s34_s14, %s34_s14  ;;  %p16_p4 = scmp.lt.u32.totalorder %s34_s14, %s2_s8 }
   0x6   :  { %p15_p3 = por %p14_p2, %p13_p1 }
   0x8   :  { %p17_p5 = por %p16_p4, %p15_p3 }
   0xa   :  { %p18_p6 = pnand %p17_p5, %p11_p0 }
   0xc   :  { %21 = shalt.err (!%p18_p6)  }
   0xd   :  { %s22_s17 = scalar_lea.vmem %s5_s11, 1024  ;;  %p27_p8 = scmp.lt.s32.totalorder %s5_s11, %s5_s11 }
   0xe   :  { %p23_p7 = scmp.ne.s32.totalorder %s5_s11, %s22_s17  ;;  %p28_p9 = scmp.lt.s32.totalorder %s22_s17, %s22_s17 }
  0x10   :  { %p29_p10 = por %p28_p9, %p27_p8 }
  0x12   :  { %p30_p11 = pnand %p29_p10, %p23_p7 }
  0x14   :  { %33 = shalt.err (!%p30_p11)  }
  0x15   :  { %7 = dma.hbm_to_vmem [thread:$0]  %s2_s8, 1024, %s5_s11, [#allocation0] }
  0x16   :  { %35 = dma.done.wait [#allocation0], 1024  }
  0x17   :  { %36 = vsyncadd [#allocation0], 4294966272 }
  0x18   :  { %9 = vsyncpa [#allocation0], 1 }

// kernel: custom-call
= control target key start
LH: loop header
LB: loop body
LE: loop exit
PB: predicated region body
PF: predicated region fallthrough
CT: control target
= control target key end

     0   :  { %2 = vsyncpa [#allocation0], 0  ;;  %s61_s0 = inlined_call_operand.hbm [shape: c64[2,32,32], index: 0, kind: input, shape index: {}]   ;;  %s62_s1 = inlined_call_operand.vmem [shape: f32[2,32,32], index: 1, kind: output, shape index: {}]  }
   0x1   :  { %s3_s8 = sshll.u32 %s62_s1, 4  ;;  %s9_s11 = scalar_lea.hbm %s61_s0, 1024  ;;  %s4_s8 = int_to_ptr.vmem [resolvable:$true] %s3_s8 }
   0x2   :  { %p10_p0 = scmp.ne.s32.totalorder %s61_s0, %s9_s11  ;;  %s11_s16 = scalar_lea.hbm %s61_s0, 2048 }
   0x3   :  { %p12_p1 = scmp.lt.u32.totalorder %s11_s16, %s9_s11  ;;  %p13_p2 = scmp.lt.u32.totalorder %s9_s11, %s61_s0 }
   0x5   :  { %p14_p3 = por %p13_p2, %p12_p1 }
   0x7   :  { %p15_p4 = pnand %p14_p3, %p10_p0 }
   0x9   :  { %18 = shalt.err (!%p15_p4)  }
   0xa   :  { %s19_s1 = scalar_lea.vmem %s4_s8, 1024  ;;  %p24_p6 = scmp.lt.s32.totalorder %s4_s8, %s4_s8 }
   0xb   :  { %p20_p5 = scmp.ne.s32.totalorder %s4_s8, %s19_s1  ;;  %p25_p7 = scmp.lt.s32.totalorder %s19_s1, %s19_s1 }
   0xd   :  { %p26_p8 = por %p25_p7, %p24_p6 }
   0xf   :  { %p27_p9 = pnand %p26_p8, %p20_p5 }
  0x11   :  { %30 = shalt.err (!%p27_p9)  }
  0x12   :  { %6 = dma.hbm_to_vmem [thread:$0]  %s61_s0, 1024, %s4_s8, [#allocation0] }
  0x13   :  { %31 = dma.done.wait [#allocation0], 1024  }
  0x14   :  { %32 = vsyncadd [#allocation0], 4294966272 }
  0x15   :  { %8 = vsyncpa [#allocation0], 1 }

// kernel: fourier_space_model.1
= control target key start
LH: loop header
LB: loop body
LE: loop exit
PB: predicated region body
PF: predicated region fallthrough
CT: control target
= control target key end

     0   :  { %vm417_vm0 = vcmask 523264   ;;  %vm539_vm1 = vcmask 1043456   ;;  %vm2725_vm2 = vmmov 0   ;;  %vm628_vm3 = vcmask 261120   ;;  %s3441_s1 = inlined_call_operand.vmem [shape: bf16[512,64], index: 1, kind: input, shape index: {}]   ;;  %s3442_s0 = inlined_call_operand.vmem [shape: bf16[8,512], index: 0, kind: input, shape index: {}]   ;;  %s3443_s2 = inlined_call_operand.vmem [shape: f32[8,64], index: 2, kind: input, shape index: {}]   ;;  %s3444_s3 = inlined_call_operand.vmem [shape: bf16[2,64,192], index: 3, kind: input, shape index: {}]   ;;  %s3445_s9 = inlined_call_operand.vmem [shape: bf16[32,64], index: 9, kind: input, shape index: {}]   ;;  %s3446_s7 = inlined_call_operand.vmem [shape: f32[2,6,64], index: 7, kind: input, shape index: {}]   ;;  %s3447_s10 = inlined_call_operand.vmem [shape: f32[8,32], index: 10, kind: input, shape index: {}]   ;;  %s3448_s11 = inlined_call_operand.vmem [shape: f32[32,32], index: 11, kind: input, shape index: {}]   ;;  %s3449_s4 = inlined_call_operand.vmem [shape: bf16[2,64,64], index: 4, kind: input, shape index: {}]   ;;  %s3450_s5 = inlined_call_operand.vmem [shape: bf16[2,64,128], index: 5, kind: input, shape index: {}]   ;;  %s3451_s6 = inlined_call_operand.vmem [shape: bf16[2,128,64], index: 6, kind: input, shape index: {}]   ;;  %s3452_s8 = inlined_call_operand.vmem [shape: f32[2,1,128], index: 8, kind: input, shape index: {}]   ;;  %s3453_s13 = inlined_call_operand.vmem [shape: bf16[64,128], index: 13, kind: input, shape index: {}]   ;;  %s3454_s14 = inlined_call_operand.vmem [shape: bf16[128,512], index: 14, kind: input, shape index: {}]   ;;  %s3455_s12 = inlined_call_operand.vmem [shape: f32[2,64], index: 12, kind: input, shape index: {}]   ;;  %s3456_s15 = inlined_call_operand.vmem [shape: f32[1,512], index: 15, kind: input, shape index: {}]   ;;  %s3457_s16 = inlined_call_operand.vmem [shape: f32[8,512], index: 16, kind: output, shape index: {}]  }
   0x1   :  { %3459 = sst [smem:[#allocation2_spill]] %s3441_s1  ;;  %v54_v32 = vld [vmem:[%s3442_s0] sm:$0xff]  ;;  %v55_v33 = vld [vmem:[%s3442_s0 + $0x8] sm:$0xff]  ;;  %v2595_v59 = vld [vmem:[%s3444_s3 + $0x14] ss:$8 sps:$4 sm:$0xff]  }
   0x2   :  { %s3460_s23 = sld [smem:[#allocation2_spill]]  ;;  %v2095_v34 = vcombine.low %v54_v32, %v54_v32  ;;  %v2096_v35 = vcombine.high %v54_v32, %v54_v32  ;;  %v2097_v36 = vcombine.low %v55_v33, %v55_v33  ;;  %v2098_v37 = vcombine.high %v55_v33, %v55_v33  ;;  %v120_v40 = vld [vmem:[%s3443_s2] sm:$0xff]  ;;  %v2593_v60 = vld [vmem:[%s3444_s3 + $0x10] ss:$8 sps:$4 sm:$0xff]   ;;  %v2601_v63 = vld [vmem:[%s3444_s3 + $0x34] ss:$8 sps:$4 sm:$0xff]  }
   0x3   :  { %v2592_v57 = vld [vmem:[%s3444_s3 + $0x4] ss:$8 sps:$4 sm:$0xff]   ;;  %v2590_v58 = vld [vmem:[%s3444_s3] ss:$8 sps:$4 sm:$0xff]   ;;  %s2723_s2 = smov 64  }
   0x4   :  { %359 = vmatprep.mubr.bf16.mxu0 %v2096_v35  ;;  %399 = vmatprep.mubr.bf16.mxu1 %v2098_v37  ;;  %v2598_v61 = vld [vmem:[%s3444_s3 + $0x24] ss:$8 sps:$4 sm:$0xff]   ;;  %v2596_v62 = vld [vmem:[%s3444_s3 + $0x20] ss:$8 sps:$4 sm:$0xff]  }
   0x8   :  { %v2554_v0 = vld [vmem:[%s3460_s23 + $0x40] sm:$0xff]   ;;  %v2558_v4 = vld [vmem:[%s3460_s23 + $0x48] sm:$0xff]   ;;  %v2562_v8 = vld [vmem:[%s3460_s23 + $0x50] sm:$0xff]  }
   0x9   :  { %v2555_v1 = vld [vmem:[%s3460_s23 + $0xc0] sm:$0xff]   ;;  %2274 = vmatprep.subr.bf16.mxu0 %v2554_v0  ;;  %v2559_v5 = vld [vmem:[%s3460_s23 + $0xc8] sm:$0xff]   ;;  %v2563_v9 = vld [vmem:[%s3460_s23 + $0xd0] sm:$0xff]  }
   0xa   :  { %v2556_v2 = vld [vmem:[%s3460_s23] sm:$0xff]   ;;  %2296 = vmatprep.subr.bf16.mxu1 %v2555_v1  ;;  %v2560_v6 = vld [vmem:[%s3460_s23 + $0x8] sm:$0xff]   ;;  %v2564_v10 = vld [vmem:[%s3460_s23 + $0x10] sm:$0xff]   ;;  %v2722_v1 = vmov 0  }
   0xb   :  { %v2557_v3 = vld [vmem:[%s3460_s23 + $0x80] sm:$0xff]   ;;  %2275 = vmatpush3.bf16.msra.mxu0 %v2556_v2  ;;  %v2561_v7 = vld [vmem:[%s3460_s23 + $0x88] sm:$0xff]   ;;  %v2565_v11 = vld [vmem:[%s3460_s23 + $0x90] sm:$0xff]  }
   0xc   :  { %2297 = vmatpush3.bf16.msra.mxu1 %v2557_v3  ;;  %2276 = vmatprep.subr.bf16.mxu0 %v2558_v4  ;;  %v2566_v12 = vld [vmem:[%s3460_s23 + $0x58] sm:$0xff]   ;;  %v2570_v16 = vld [vmem:[%s3460_s23 + $0x60] sm:$0xff]   ;;  %v2574_v20 = vld [vmem:[%s3460_s23 + $0x68] sm:$0xff]  }
   0xd   :  { %2298 = vmatprep.subr.bf16.mxu1 %v2559_v5  ;;  %v2567_v13 = vld [vmem:[%s3460_s23 + $0xd8] sm:$0xff]   ;;  %v2571_v17 = vld [vmem:[%s3460_s23 + $0xe0] sm:$0xff]   ;;  %v2575_v21 = vld [vmem:[%s3460_s23 + $0xe8] sm:$0xff]  }
   0xe   :  { %v2568_v14 = vld [vmem:[%s3460_s23 + $0x18] sm:$0xff]   ;;  %v2572_v18 = vld [vmem:[%s3460_s23 + $0x20] sm:$0xff]   ;;  %v2576_v22 = vld [vmem:[%s3460_s23 + $0x28] sm:$0xff]  }
   0xf   :  { %2277 = vmatpush3.bf16.msra.mxu0 %v2560_v6  ;;  %v2569_v15 = vld [vmem:[%s3460_s23 + $0x98] sm:$0xff]   ;;  %v2573_v19 = vld [vmem:[%s3460_s23 + $0xa0] sm:$0xff]   ;;  %v2577_v23 = vld [vmem:[%s3460_s23 + $0xa8] sm:$0xff]   ;;  %v432_v6 = vlaneseq }
  0x10   :  { %2299 = vmatpush3.bf16.msra.mxu1 %v2561_v7  ;;  %2278 = vmatprep.subr.bf16.mxu0 %v2562_v8  ;;  %v2578_v24 = vld [vmem:[%s3460_s23 + $0x70] sm:$0xff]   ;;  %v2582_v28 = vld [vmem:[%s3460_s23 + $0x78] sm:$0xff]   ;;  %v2951_v2 = vld [vmem:[%s3445_s9] sm:$0xff]  }
  0x11   :  { %2300 = vmatprep.subr.bf16.mxu1 %v2563_v9  ;;  %v2579_v25 = vld [vmem:[%s3460_s23 + $0xf0] sm:$0xff]   ;;  %v2583_v29 = vld [vmem:[%s3460_s23 + $0xf8] sm:$0xff]   ;;  %554 = vrot.lane.b32.xlu1 %v2951_v2, %s2723_s2  ;;  %v2958_v3 = vld [vmem:[%s3445_s9 + $0x8] sm:$0xff]   ;;  %v2962_v8 = vshrl.u32 %v432_v6, 7 }
  0x12   :  { %v2580_v26 = vld [vmem:[%s3460_s23 + $0x30] sm:$0xff]   ;;  %v2584_v30 = vld [vmem:[%s3460_s23 + $0x38] sm:$0xff]  }
  0x13   :  { %2279 = vmatpush3.bf16.msra.mxu0 %v2564_v10  ;;  %v2581_v27 = vld [vmem:[%s3460_s23 + $0xb0] sm:$0xff]   ;;  %v2585_v31 = vld [vmem:[%s3460_s23 + $0xb8] sm:$0xff]   ;;  %v2965_v9 = vsub.s32 0, %v2962_v8  ;;  %v2970_v10 = vld [vmem:[%s3446_s7] sm:$0x3f] }
  0x14   :  { %2301 = vmatpush3.bf16.msra.mxu1 %v2565_v11  ;;  %2280 = vmatprep.subr.bf16.mxu0 %v2566_v12  ;;  %v2599_v0 = vld [vmem:[%s3444_s3 + $0x30] ss:$8 sps:$4 sm:$0xff]   ;;  %v2973_v11 = vsub.s32 1, %v2962_v8 }
  0x15   :  { %2302 = vmatprep.subr.bf16.mxu1 %v2567_v13  ;;  %556 = vrot.lane.b32.xlu1 %v2958_v3, %s2723_s2  ;;  %v435_v12 = vrot.slane %v2970_v10, %v2965_v9 }
  0x17   :  { %2281 = vmatpush3.bf16.msra.mxu0 %v2568_v14 }
  0x18   :  { %2303 = vmatpush3.bf16.msra.mxu1 %v2569_v15  ;;  %2282 = vmatprep.subr.bf16.mxu0 %v2570_v16  ;;  %v440_v15 = vrot.slane %v2970_v10, %v2973_v11 }
  0x19   :  { %2304 = vmatprep.subr.bf16.mxu1 %v2571_v17 }
  0x1b   :  { %2283 = vmatpush3.bf16.msra.mxu0 %v2572_v18 }
  0x1c   :  { %2305 = vmatpush3.bf16.msra.mxu1 %v2573_v19  ;;  %2284 = vmatprep.subr.bf16.mxu0 %v2574_v20  ;;  %v2724_v19 = vmov 0.0  }
  0x1d   :  { %2306 = vmatprep.subr.bf16.mxu1 %v2575_v21 }
  0x1f   :  { %2285 = vmatpush3.bf16.msra.mxu0 %v2576_v22 }
  0x20   :  { %2307 = vmatpush3.bf16.msra.mxu1 %v2577_v23  ;;  %2286 = vmatprep.subr.bf16.mxu0 %v2578_v24 }
  0x21   :  { %2308 = vmatprep.subr.bf16.mxu1 %v2579_v25 }
  0x23   :  { %2287 = vmatpush3.bf16.msra.mxu0 %v2580_v26 }
  0x24   :  { %2309 = vmatpush3.bf16.msra.mxu1 %v2581_v27  ;;  %2288 = vmatprep.subr.bf16.mxu0 %v2582_v28 }
  0x25   :  { %2310 = vmatprep.subr.bf16.mxu1 %v2583_v29 }
  0x27   :  { %2289 = vmatpush3.bf16.msra.mxu0 %v2584_v30 }
  0x28   :  { %2311 = vmatpush3.bf16.msra.mxu1 %v2585_v31  ;;  %494 = vmatprep.subr.bf16.mxu0 %v2592_v57 }
  0x29   :  { %2383 = vmatprep.subr.bf16.mxu1 %v2724_v19 }
  0x2a   :  { %360 = vmatmul.mubr.bf16.vlgmr.msra.gmra.mrb[0].mxu0 %v2095_v34 }
  0x2b   :  { %400 = vmatmul.mubr.bf16.vlgmr.msra.gmra.mrb[0].mxu1 %v2097_v36  ;;  %495 = vmatpush1.bf16.msra.mxu0 %v2590_v58  ;;  %v3004_v36 = vld [vmem:[%s3447_s10] sm:$0xff] }
  0x2c   :  { %496 = vmatprep.subr.bf16.mxu0 %v2595_v59  ;;  %526 = vmatprep.mubr.bf16.mxu0 %v2722_v1 }
  0x2d   :  { %2387 = vmatprep.mubr.msk.bf16.mxu1 %vm2725_vm2, %v2724_v19 }
  0x2f   :  { %497 = vmatpush1.bf16.msra.mxu0 %v2593_v60  ;;  %v2604_v60 = vld [vmem:[%s3449_s4] sm:$0xff]  }
  0x30   :  { %498 = vmatprep.subr.bf16.mxu0 %v2598_v61  ;;  %v2605_v61 = vld [vmem:[%s3449_s4 + $0x8] sm:$0xff]  }
  0x33   :  { %499 = vmatpush1.bf16.msra.mxu0 %v2596_v62  ;;  %v2606_v62 = vld [vmem:[%s3449_s4 + $0x10] sm:$0xff]  }
  0x34   :  { %500 = vmatprep.subr.bf16.mxu0 %v2601_v63 }
  0x37   :  { %501 = vmatpush1.bf16.msra.mxu0 %v2599_v0 }
  0x38   :  { %2410 = vmatprep.subr.bf16.mxu0 %v2724_v19 }
  0x83   :  { %v2982_v20 = vpop.permute.xlu1 %554 }
  0x87   :  { %v2984_v27 = vpop.permute.xlu1 %556 }
  0xfd   :  { %v2290_v38 = vpop.f32.mrb[0].mxu0 }
  0xfe   :  { %v2312_v39 = vpop.f32.mrb[0].mxu1  ;;  %v2291_v41 = vpop.f32.mrb[1].mxu0 }
  0xff   :  { %v2313_v42 = vpop.f32.mrb[1].mxu1  ;;  %v2292_v43 = vadd.f32 %v2291_v41, %v2290_v38  ;;  %v2293_v45 = vpop.f32.mrb[2].mxu0 }
 0x100   :  { %v2314_v44 = vadd.f32 %v2313_v42, %v2312_v39  ;;  %v2315_v46 = vpop.f32.mrb[2].mxu1  ;;  %v2294_v47 = vpop.f32.mrb[3].mxu0  ;;  %v414_v45 = vld [vmem:[%s3448_s11 + $0x10] sm:$0xff] }
 0x101   :  { %v2316_v48 = vpop.f32.mrb[3].mxu1  ;;  %v362_v49 = vadd.f32 %v2292_v43, %v120_v40  ;;  %v412_v43 = vld [vmem:[%s3448_s11] sm:$0xff]  ;;  %v2726_v46 = vmov 0.0|0.0  }
 0x102   :  { %v415_v48 = vld [vmem:[%s3448_s11 + $0x18] sm:$0xff] }
 0x103   :  { %v2917_v50 = vadd.f32 %v2314_v44, %v362_v49  ;;  %v413_v44 = vld [vmem:[%s3448_s11 + $0x8] sm:$0xff]  ;;  %v3024_v49 = vpack.c.bf16 %v415_v48, %v414_v45 }
 0x104   :  { %v3018_v47 = vpack.c.bf16 %v413_v44, %v412_v43  ;;  %v856_v43 = vsub.s32 4, %v2962_v8 }
 0x105   :  { %v418_v51 = vsel %vm417_vm0, %v2917_v50, 0.0 }
 0x106   :  { %419 = vadd.xlane.f32.xlu0 %v418_v51 }
 0x193   :  { %v420_v52 = vpop.xlane.xlu0 %419 }
 0x194   :  { %v422_v53 = vmul.f32 0.015625, %v420_v52 }
 0x196   :  { %v423_v54 = vsub.f32 %v2917_v50, %v422_v53 }
 0x198   :  { %v424_v55 = vmul.f32 %v423_v54, %v423_v54 }
 0x19a   :  { %v425_v56 = vsel %vm417_vm0, %v424_v55, 0.0 }
 0x19b   :  { %426 = vadd.xlane.f32.xlu0 %v425_v56 }
 0x228   :  { %v427_v4 = vpop.xlane.xlu0 %426 }
 0x229   :  { %v428_v5 = vmul.f32 0.015625, %v427_v4 }
 0x22b   :  { %v429_v7 = vadd.f32 1e-05, %v428_v5 }
 0x22d   :  { %2700 = vrsqrt.f32 %v429_v7 }
 0x237   :  { %v2701_v13 = vpop.eup %2700 }
 0x238   :  { %v431_v14 = vmul.f32 %v2701_v13, %v423_v54 }
 0x23a   :  { %v436_v16 = vmul.f32 %v435_v12, %v431_v14  ;;  %v2607_v12 = vld [vmem:[%s3449_s4 + $0x18] sm:$0xff]  }
 0x23c   :  { %v441_v17 = vadd.f32 %v440_v15, %v436_v16 }
 0x23e   :  { %v442_v18 = vpack.c.bf16 %v441_v17, %v441_v17 }
 0x240   :  { %2139 = vmatmul.mubr.msk.bf16.vlgmr.msra.gmra.mrb[4].mxu0 %vm417_vm0, %v442_v18  ;;  %v3060_v18 = vsub.s32 2, %v2962_v8 }
 0x241   :  { %2418 = vmatprep.mubr.msk.bf16.mxu0 %vm2725_vm2, %v2724_v19  ;;  %2411 = vmatpush3.bf16.msra.mxu0 %v2604_v60  ;;  %v2617_v60 = vld [vmem:[%s3451_s6 + $0x28] sm:$0xff]  }
 0x242   :  { %2412 = vmatprep.subr.bf16.mxu0 %v2724_v19 }
 0x245   :  { %2413 = vmatpush3.bf16.msra.mxu0 %v2605_v61  ;;  %v2618_v61 = vld [vmem:[%s3451_s6 + $0x30] sm:$0xff]  }
 0x246   :  { %2414 = vmatprep.subr.bf16.mxu0 %v2724_v19 }
 0x249   :  { %2415 = vmatpush3.bf16.msra.mxu0 %v2606_v62  ;;  %v2619_v62 = vld [vmem:[%s3451_s6 + $0x38] sm:$0xff]  }
 0x24a   :  { %2416 = vmatprep.subr.bf16.mxu0 %v2724_v19 }
 0x24d   :  { %2417 = vmatpush3.bf16.msra.mxu0 %v2607_v12 }
 0x24e   :  { %2434 = vmatprep.subr.bf16.mxu0 %v2724_v19 }
 0x313   :  { %v528_v21 = vpop.f32.mrb[4].mxu0 }
 0x314   :  { %v535_v22 = vpack.c.bf16 %v528_v21, %v528_v21  ;;  %v530_v23 = vpop.f32.mrb[5].mxu0  ;;  %v767_v21 = vrot.slane %v2970_v10, %v3060_v18 }
 0x315   :  { %v532_v24 = vpop.f32.mrb[6].mxu0  ;;  %v536_v54 = vpack.c.bf16 %v530_v23, %v530_v23 }
 0x316   :  { %v538_v25 = vrot.slane %v535_v22, 4  ;;  %v533_v26 = vpop.f32.mrb[7].mxu0 }
 0x317   :  { %v563_v55 = vrot.slane %v536_v54, 4 }
 0x318   :  { %v542_v28 = vsel %vm539_vm1, %v535_v22, %v538_v25 }
 0x319   :  { %v560_v29 = vmul.bf16 %v2982_v20, %v542_v28  ;;  %v561_v30 = vmul.bf16 %v2984_v27, %v542_v28  ;;  %v566_v56 = vsel %vm539_vm1, %v536_v54, %v563_v55  ;;  %v2612_v55 = vld [vmem:[%s3451_s6] sm:$0xff]  }
 0x31a   :  { %v570_v58 = vmul.bf16 %v2951_v2, %v566_v56  ;;  %v571_v59 = vmul.bf16 %v2958_v3, %v566_v56  ;;  %v2613_v56 = vld [vmem:[%s3451_s6 + $0x8] sm:$0xff]  }
 0x31b   :  { %576 = vrot.lane.b32.xlu1 %v561_v30, %s2723_s2  ;;  %574 = vrot.lane.b32.xlu0 %v560_v29, %s2723_s2 }
 0x38d   :  { %v575_v31 = vpop.permute.xlu0 %574  ;;  %v577_v33 = vpop.permute.xlu1 %576 }
 0x38e   :  { %v581_v32 = vsel %vm417_vm0, %v575_v31, 0  ;;  %v584_v34 = vsel %vm417_vm0, %v577_v33, 0 }
 0x38f   :  { %2384 = vmatpush3.bf16.xpose.msra.mxu1 %v581_v32 }
 0x390   :  { %2385 = vmatprep.subr.bf16.mxu1 %v2724_v19 }
 0x397   :  { %2386 = vmatpush3.bf16.xpose.msra.mxu1 %v584_v34 }
 0x398   :  { %2537 = vmatprep.subr.bf16.mxu1 %v2726_v46 }
 0x39e   :  { %2388 = vmatmul.mubr.msk.bf16.vlgmr.msra.gmra.mrb[4].mxu1 %vm417_vm0, %v535_v22 }
 0x39f   :  { %2399 = vmatprep.mubr.msk.f32.mxu1 %vm2725_vm2, %v2724_v19  ;;  %2539 = vmatpush3.bf16.msra.mxu1 %v3018_v47 }
 0x3a0   :  { %2540 = vmatprep.subr.bf16.mxu1 %v2726_v46 }
 0x3a3   :  { %2542 = vmatpush3.bf16.msra.mxu1 %v3024_v49 }
 0x3a4   :  { %2402 = vmatprep.subr.bf16.mxu1 %v2724_v19 }
 0x471   :  { %v620_v35 = vpop.f32.mrb[4].mxu1 }
 0x472   :  { %v626_v37 = vmul.f32 0.25, %v620_v35  ;;  %v2389_v38 = vpop.f32.mrb[5].mxu1  ;;  %v2608_v35 = vld [vmem:[%s3450_s5] sm:$0xff]  }
 0x473   :  { %v623_v39 = vpop.f32.mrb[6].mxu1  ;;  %v2611_v38 = vld [vmem:[%s3450_s5 + $0x18] sm:$0xff]  }
 0x474   :  { %v2390_v40 = vpop.f32.mrb[7].mxu1  ;;  %v627_v41 = vadd.f32 %v626_v37, %v3004_v36  ;;  %v2610_v37 = vld [vmem:[%s3450_s5 + $0x10] sm:$0xff]  }
 0x476   :  { %v629_v42 = vsel %vm628_vm3, %v627_v41, -inf }
 0x477   :  { %630 = vmax.xlane.f32.xlu1 %v629_v42  ;;  %v3087_v42 = vsub.s32 3, %v2962_v8 }
 0x479   :  { %v852_v44 = vrot.slane %v2970_v10, %v3087_v42 }
 0x504   :  { %v631_v51 = vpop.xlane.xlu1 %630 }
 0x505   :  { %v632_v52 = vsub.f32 %v627_v41, %v631_v51  ;;  %v857_v51 = vrot.slane %v2970_v10, %v856_v43 }
 0x507   :  { %v633_v53 = vmul.f32 1.442695, %v632_v52 }
 0x509   :  { %2702 = vpow2.f32 %v633_v53 }
 0x513   :  { %v2703_v57 = vpop.eup %2702 }
 0x514   :  { %2400 = vmatmul.mubr.msk.f32.vlgmr.msra.gmra.mrb[8].mxu1 %vm628_vm3, %v2703_v57 }
 0x515   :  { %2403 = vmatpush3.bf16.msra.mxu1 %v570_v58  ;;  %2406 = vmatprep.mubr.msk.bf16.mxu1 %vm2725_vm2, %v2724_v19  ;;  %v2615_v58 = vld [vmem:[%s3451_s6 + $0x18] sm:$0xff]  }
 0x516   :  { %2404 = vmatprep.subr.bf16.mxu1 %v2724_v19 }
 0x519   :  { %2405 = vmatpush3.bf16.msra.mxu1 %v571_v59  ;;  %v2616_v59 = vld [vmem:[%s3451_s6 + $0x20] sm:$0xff]  }
 0x51a   :  { %2422 = vmatprep.subr.bf16.mxu1 %v2724_v19 }
 0x5e7   :  { %v704_v63 = vpop.f32.mrb[8].mxu1 }
 0x5e8   :  { %v708_v0 = vmax.f32 %v704_v63, 1e-30  ;;  %v2401_v4 = vpop.f32.mrb[9].mxu1  ;;  %v2150_v63 = vld [vmem:[%s3452_s8] ss:$0 sm:$0xff] }
 0x5ea   :  { %2704 = vrcp.f32 %v708_v0 }
 0x5f4   :  { %v2705_v5 = vpop.eup %2704 }
 0x5f5   :  { %v710_v6 = vmul.f32 %v2705_v5, %v2703_v57  ;;  %v2614_v57 = vld [vmem:[%s3451_s6 + $0x10] sm:$0xff]  }
 0x5f7   :  { %v711_v7 = vpack.c.bf16 %v710_v6, %v710_v6 }
 0x5f9   :  { %2407 = vmatmul.mubr.msk.bf16.vlgmr.msra.gmra.mrb[12].mxu1 %vm628_vm3, %v711_v7 }
 0x5fa   :  { %2430 = vmatprep.mubr.msk.bf16.mxu1 %vm2725_vm2, %v2724_v19  ;;  %2423 = vmatpush3.bf16.msra.mxu1 %v2608_v35 }
 0x5fb   :  { %2424 = vmatprep.subr.bf16.mxu1 %v2724_v19 }
 0x6cc   :  { %v749_v13 = vpop.f32.mrb[12].mxu1 }
 0x6cd   :  { %v755_v14 = vpack.c.bf16 %v749_v13, %v749_v13  ;;  %v2408_v15 = vpop.f32.mrb[13].mxu1 }
 0x6ce   :  { %v752_v16 = vpop.f32.mrb[14].mxu1 }
 0x6cf   :  { %v2409_v17 = vpop.f32.mrb[15].mxu1  ;;  %2419 = vmatmul.mubr.msk.bf16.vlgmr.msra.gmra.mrb[8].mxu0 %vm417_vm0, %v755_v14 }
 0x6d0   :  { %2450 = vmatprep.mubr.msk.bf16.mxu0 %vm2725_vm2, %v2724_v19  ;;  %2435 = vmatpush3.bf16.msra.mxu0 %v2612_v55 }
 0x6d1   :  { %2436 = vmatprep.subr.bf16.mxu0 %v2724_v19 }
 0x6d4   :  { %2437 = vmatpush3.bf16.msra.mxu0 %v2613_v56 }
 0x6d5   :  { %2438 = vmatprep.subr.bf16.mxu0 %v2724_v19 }
 0x6d8   :  { %2439 = vmatpush3.bf16.msra.mxu0 %v2614_v57 }
 0x6d9   :  { %2440 = vmatprep.subr.bf16.mxu0 %v2724_v19 }
 0x6dc   :  { %2441 = vmatpush3.bf16.msra.mxu0 %v2615_v58 }
 0x6dd   :  { %2442 = vmatprep.subr.bf16.mxu0 %v2724_v19 }
 0x6e0   :  { %2443 = vmatpush3.bf16.msra.mxu0 %v2616_v59 }
 0x6e1   :  { %2444 = vmatprep.subr.bf16.mxu0 %v2724_v19 }
 0x6e4   :  { %2445 = vmatpush3.bf16.msra.mxu0 %v2617_v60 }
 0x6e5   :  { %2446 = vmatprep.subr.bf16.mxu0 %v2724_v19 }
 0x6e8   :  { %2447 = vmatpush3.bf16.msra.mxu0 %v2618_v61 }
 0x6e9   :  { %2448 = vmatprep.subr.bf16.mxu0 %v2724_v19 }
 0x6ec   :  { %2449 = vmatpush3.bf16.msra.mxu0 %v2619_v62 }
 0x6ed   :  { %2543 = vmatprep.subr.bf16.mxu0 %v2726_v46 }
 0x7a2   :  { %v829_v22 = vpop.f32.mrb[8].mxu0 }
 0x7a3   :  { %v830_v23 = vadd.f32 %v829_v22, %v767_v21  ;;  %v2420_v24 = vpop.f32.mrb[9].mxu0 }
 0x7a4   :  { %v832_v25 = vpop.f32.mrb[10].mxu0 }
 0x7a5   :  { %v3065_v26 = vadd.f32 %v830_v23, %v2917_v50  ;;  %v2421_v28 = vpop.f32.mrb[11].mxu0  ;;  %v2609_v50 = vld [vmem:[%s3450_s5 + $0x8] sm:$0xff]   ;;  %v970_v25 = vsub.s32 5, %v2962_v8  ;;  %v2648_v8 = vld [vmem:[%s3453_s13] sm:$0xff]  }
 0x7a6   :  { %2425 = vmatpush3.bf16.msra.mxu1 %v2609_v50 }
 0x7a7   :  { %v836_v29 = vsel %vm417_vm0, %v3065_v26, 0.0  ;;  %2426 = vmatprep.subr.bf16.mxu1 %v2724_v19  ;;  %v971_v28 = vrot.slane %v2970_v10, %v970_v25  ;;  %v2622_v10 = vld [vmem:[%s3444_s3 + $0x44] ss:$8 sps:$4 sm:$0xff]  }
 0x7a8   :  { %837 = vadd.xlane.f32.xlu0 %v836_v29 }
 0x7aa   :  { %2427 = vmatpush3.bf16.msra.mxu1 %v2610_v37 }
 0x7ab   :  { %2428 = vmatprep.subr.bf16.mxu1 %v2724_v19 }
 0x7ae   :  { %2429 = vmatpush3.bf16.msra.mxu1 %v2611_v38  ;;  %v2625_v38 = vld [vmem:[%s3444_s3 + $0x54] ss:$8 sps:$4 sm:$0xff]  }
 0x7af   :  { %1139 = vmatprep.subr.bf16.mxu1 %v2622_v10 }
 0x835   :  { %v838_v30 = vpop.xlane.xlu0 %837 }
 0x836   :  { %v839_v31 = vmul.f32 0.015625, %v838_v30 }
 0x838   :  { %v840_v32 = vsub.f32 %v3065_v26, %v839_v31 }
 0x83a   :  { %v841_v33 = vmul.f32 %v840_v32, %v840_v32 }
 0x83c   :  { %v842_v34 = vsel %vm417_vm0, %v841_v33, 0.0 }
 0x83d   :  { %843 = vadd.xlane.f32.xlu1 %v842_v34 }
 0x8ca   :  { %v844_v39 = vpop.xlane.xlu1 %843 }
 0x8cb   :  { %v845_v40 = vmul.f32 0.015625, %v844_v39  ;;  %v2623_v39 = vld [vmem:[%s3444_s3 + $0x50] ss:$8 sps:$4 sm:$0xff]  }
 0x8cd   :  { %v846_v41 = vadd.f32 1e-05, %v845_v40  ;;  %v2628_v40 = vld [vmem:[%s3444_s3 + $0x64] ss:$8 sps:$4 sm:$0xff]  }
 0x8cf   :  { %2706 = vrsqrt.f32 %v846_v41  ;;  %v2626_v41 = vld [vmem:[%s3444_s3 + $0x60] ss:$8 sps:$4 sm:$0xff]  }
 0x8d9   :  { %v2707_v45 = vpop.eup %2706 }
 0x8da   :  { %v848_v48 = vmul.f32 %v2707_v45, %v840_v32  ;;  %v2629_v45 = vld [vmem:[%s3444_s3 + $0x70] ss:$8 sps:$4 sm:$0xff]  }
 0x8dc   :  { %v853_v52 = vmul.f32 %v852_v44, %v848_v48  ;;  %v2631_v44 = vld [vmem:[%s3444_s3 + $0x74] ss:$8 sps:$4 sm:$0xff]  }
 0x8de   :  { %v858_v53 = vadd.f32 %v857_v51, %v853_v52 }
 0x8e0   :  { %v859_v54 = vpack.c.bf16 %v858_v53, %v858_v53  ;;  %v3177_v53 = vld [vmem:[%s3446_s7 + $0x8] sm:$0x3f] }
 0x8e1   :  { %v1084_v57 = vrot.slane %v3177_v53, %v2973_v11 }
 0x8e2   :  { %2431 = vmatmul.mubr.msk.bf16.vlgmr.msra.gmra.mrb[16].mxu1 %vm417_vm0, %v859_v54  ;;  %v1079_v54 = vrot.slane %v3177_v53, %v2965_v9 }
 0x8e3   :  { %1171 = vmatprep.mubr.bf16.mxu1 %v2722_v1 }
 0x9b5   :  { %v936_v0 = vpop.f32.mrb[16].mxu1 }
 0x9b6   :  { %v937_v4 = vadd.f32 %v2150_v63, %v936_v0  ;;  %v2432_v5 = vpop.f32.mrb[17].mxu1 }
 0x9b7   :  { %v939_v6 = vpop.f32.mrb[18].mxu1 }
 0x9b8   :  { %v942_v7 = vmul.f32 %v937_v4, %v937_v4  ;;  %v2433_v12 = vpop.f32.mrb[19].mxu1 }
 0x9ba   :  { %v943_v13 = vmul.f32 %v942_v7, %v937_v4 }
 0x9bc   :  { %v944_v14 = vmul.f32 0.044715, %v943_v13 }
 0x9be   :  { %v945_v15 = vadd.f32 %v944_v14, %v937_v4 }
 0x9c0   :  { %v946_v16 = vmul.f32 0.7978846, %v945_v15 }
 0x9c2   :  { %2708 = vtanh.f32 %v946_v16 }
 0x9cc   :  { %v2709_v17 = vpop.eup %2708 }
 0x9cd   :  { %v948_v21 = vadd.f32 1.0, %v2709_v17 }
 0x9cf   :  { %v949_v22 = vmul.f32 0.5, %v948_v21 }
 0x9d1   :  { %v950_v23 = vmul.f32 %v949_v22, %v937_v4 }
 0x9d3   :  { %v951_v24 = vpack.c.bf16 %v950_v23, %v950_v23 }
 0x9d5   :  { %2451 = vmatmul.mubr.bf16.vlgmr.msra.gmra.mrb[12].mxu0 %v951_v24 }
 0x9d6   :  { %2545 = vmatpush3.bf16.msra.mxu0 %v3018_v47  ;;  %2470 = vmatprep.mubr.msk.f32.mxu0 %vm2725_vm2, %v2724_v19 }
 0x9d7   :  { %2546 = vmatprep.subr.bf16.mxu0 %v2726_v46 }
 0x9da   :  { %2548 = vmatpush3.bf16.msra.mxu0 %v3024_v49 }
 0x9db   :  { %2481 = vmatprep.subr.bf16.mxu0 %v2724_v19 }
 0xaa8   :  { %v1054_v29 = vpop.f32.mrb[12].mxu0 }
 0xaa9   :  { %v1055_v30 = vadd.f32 %v1054_v29, %v971_v28  ;;  %v2452_v31 = vpop.f32.mrb[13].mxu0 }
 0xaaa   :  { %v1057_v32 = vpop.f32.mrb[14].mxu0 }
 0xaab   :  { %v3143_v47 = vadd.f32 %v1055_v30, %v3065_v26  ;;  %v2453_v33 = vpop.f32.mrb[15].mxu0  ;;  %v2620_v26 = vld [vmem:[%s3444_s3 + $0x40] ss:$8 sps:$4 sm:$0xff]  }
 0xaac   :  { %1140 = vmatpush1.bf16.msra.mxu1 %v2620_v26 }
 0xaad   :  { %v1063_v46 = vsel %vm417_vm0, %v3143_v47, 0.0  ;;  %1141 = vmatprep.subr.bf16.mxu1 %v2625_v38 }
 0xaae   :  { %1064 = vadd.xlane.f32.xlu1 %v1063_v46 }
 0xab0   :  { %1142 = vmatpush1.bf16.msra.mxu1 %v2623_v39  ;;  %v2635_v39 = vld [vmem:[%s3449_s4 + $0x38] sm:$0xff]  }
 0xab1   :  { %1143 = vmatprep.subr.bf16.mxu1 %v2628_v40 }
 0xab4   :  { %1144 = vmatpush1.bf16.msra.mxu1 %v2626_v41 }
 0xab5   :  { %1145 = vmatprep.subr.bf16.mxu1 %v2631_v44 }
 0xab8   :  { %1146 = vmatpush1.bf16.msra.mxu1 %v2629_v45 }
 0xab9   :  { %2454 = vmatprep.subr.bf16.mxu1 %v2724_v19 }
 0xb3b   :  { %v1065_v49 = vpop.xlane.xlu1 %1064 }
 0xb3c   :  { %v1066_v34 = vmul.f32 0.015625, %v1065_v49 }
 0xb3e   :  { %v1067_v35 = vsub.f32 %v3143_v47, %v1066_v34  ;;  %v2634_v34 = vld [vmem:[%s3449_s4 + $0x30] sm:$0xff]  }
 0xb40   :  { %v1068_v50 = vmul.f32 %v1067_v35, %v1067_v35 }
 0xb42   :  { %v1069_v37 = vsel %vm417_vm0, %v1068_v50, 0.0 }
 0xb43   :  { %1070 = vadd.xlane.f32.xlu1 %v1069_v37 }
 0xbd0   :  { %v1071_v48 = vpop.xlane.xlu1 %1070 }
 0xbd1   :  { %v1072_v51 = vmul.f32 0.015625, %v1071_v48 }
 0xbd3   :  { %v1073_v52 = vadd.f32 1e-05, %v1072_v51  ;;  %v1393_v51 = vrot.slane %v3177_v53, %v3060_v18 }
 0xbd5   :  { %2710 = vrsqrt.f32 %v1073_v52 }
 0xbdf   :  { %v2711_v55 = vpop.eup %2710 }
 0xbe0   :  { %v1075_v56 = vmul.f32 %v2711_v55, %v1067_v35 }
 0xbe2   :  { %v1080_v58 = vmul.f32 %v1079_v54, %v1075_v56 }
 0xbe4   :  { %v1085_v59 = vadd.f32 %v1084_v57, %v1080_v58 }
 0xbe6   :  { %v1086_v60 = vpack.c.bf16 %v1085_v59, %v1085_v59 }
 0xbe8   :  { %2181 = vmatmul.mubr.msk.bf16.vlgmr.msra.gmra.mrb[20].mxu1 %vm417_vm0, %v1086_v60 }
 0xbe9   :  { %2458 = vmatprep.mubr.msk.bf16.mxu1 %vm2725_vm2, %v2724_v19 }
 0xcbb   :  { %v1173_v61 = vpop.f32.mrb[20].mxu1 }
 0xcbc   :  { %v1180_v62 = vpack.c.bf16 %v1173_v61, %v1173_v61  ;;  %v1175_v63 = vpop.f32.mrb[21].mxu1 }
 0xcbd   :  { %v1177_v0 = vpop.f32.mrb[22].mxu1  ;;  %v1181_v15 = vpack.c.bf16 %v1175_v63, %v1175_v63 }
 0xcbe   :  { %v1183_v4 = vrot.slane %v1180_v62, 4  ;;  %v1178_v5 = vpop.f32.mrb[23].mxu1 }
 0xcbf   :  { %v1191_v17 = vrot.slane %v1181_v15, 4  ;;  %v2638_v5 = vld [vmem:[%s3450_s5 + $0x30] sm:$0xff]  }
 0xcc0   :  { %v1186_v6 = vsel %vm539_vm1, %v1180_v62, %v1183_v4  ;;  %v2636_v4 = vld [vmem:[%s3450_s5 + $0x20] sm:$0xff]  }
 0xcc1   :  { %v1189_v7 = vmul.bf16 %v1186_v6, %v2984_v27  ;;  %v1188_v12 = vmul.bf16 %v1186_v6, %v2982_v20  ;;  %v1194_v20 = vsel %vm539_vm1, %v1181_v15, %v1191_v17  ;;  %v2639_v6 = vld [vmem:[%s3450_s5 + $0x38] sm:$0xff]   ;;  %v1483_v17 = vrot.slane %v3177_v53, %v856_v43  ;;  %v2642_v43 = vld [vmem:[%s3451_s6 + $0x50] sm:$0xff]  }
 0xcc2   :  { %v1196_v27 = vmul.bf16 %v2951_v2, %v1194_v20  ;;  %v1197_v22 = vmul.bf16 %v2958_v3, %v1194_v20  ;;  %v2632_v3 = vld [vmem:[%s3449_s4 + $0x20] sm:$0xff]  }
 0xcc3   :  { %1202 = vrot.lane.b32.xlu0 %v1189_v7, %s2723_s2  ;;  %1200 = vrot.lane.b32.xlu1 %v1188_v12, %s2723_s2 }
 0xd35   :  { %v1201_v13 = vpop.permute.xlu1 %1200  ;;  %v1203_v16 = vpop.permute.xlu0 %1202 }
 0xd36   :  { %v1207_v14 = vsel %vm417_vm0, %v1201_v13, 0  ;;  %v1210_v21 = vsel %vm417_vm0, %v1203_v16, 0 }
 0xd37   :  { %2455 = vmatpush3.bf16.xpose.msra.mxu1 %v1207_v14  ;;  %v1478_v14 = vrot.slane %v3177_v53, %v3087_v42 }
 0xd38   :  { %2456 = vmatprep.subr.bf16.mxu1 %v2724_v19 }
 0xd3f   :  { %2457 = vmatpush3.bf16.xpose.msra.mxu1 %v1210_v21 }
 0xd40   :  { %2473 = vmatprep.subr.bf16.mxu1 %v2724_v19 }
 0xd46   :  { %2459 = vmatmul.mubr.msk.bf16.vlgmr.msra.gmra.mrb[24].mxu1 %vm417_vm0, %v1180_v62 }
 0xd47   :  { %2474 = vmatpush3.bf16.msra.mxu1 %v1196_v27  ;;  %2477 = vmatprep.mubr.msk.bf16.mxu1 %vm2725_vm2, %v2724_v19 }
 0xd48   :  { %2475 = vmatprep.subr.bf16.mxu1 %v2724_v19 }
 0xd4b   :  { %2476 = vmatpush3.bf16.msra.mxu1 %v1197_v22  ;;  %v2640_v22 = vld [vmem:[%s3451_s6 + $0x40] sm:$0xff]  }
 0xd4c   :  { %2493 = vmatprep.subr.bf16.mxu1 %v2724_v19 }
 0xe19   :  { %v1246_v23 = vpop.f32.mrb[24].mxu1 }
 0xe1a   :  { %v1252_v24 = vmul.f32 0.25, %v1246_v23  ;;  %v2460_v28 = vpop.f32.mrb[25].mxu1  ;;  %v2641_v23 = vld [vmem:[%s3451_s6 + $0x48] sm:$0xff]  }
 0xe1b   :  { %v1249_v29 = vpop.f32.mrb[26].mxu1  ;;  %v2644_v28 = vld [vmem:[%s3451_s6 + $0x60] sm:$0xff]  }
 0xe1c   :  { %v2461_v30 = vpop.f32.mrb[27].mxu1  ;;  %v1253_v2 = vadd.f32 %v1252_v24, %v3004_v36  ;;  %v2633_v36 = vld [vmem:[%s3449_s4 + $0x28] sm:$0xff]   ;;  %v2643_v24 = vld [vmem:[%s3451_s6 + $0x58] sm:$0xff]  }
 0xe1d   :  { %v2645_v29 = vld [vmem:[%s3451_s6 + $0x68] sm:$0xff]   ;;  %v2646_v30 = vld [vmem:[%s3451_s6 + $0x70] sm:$0xff]  }
 0xe1e   :  { %v1254_v31 = vsel %vm628_vm3, %v1253_v2, -inf }
 0xe1f   :  { %1255 = vmax.xlane.f32.xlu1 %v1254_v31  ;;  %v2207_v31 = vld [vmem:[%s3452_s8 + $0x1] ss:$0 sm:$0xff] }
 0xeac   :  { %v1256_v32 = vpop.xlane.xlu1 %1255 }
 0xead   :  { %v1257_v33 = vsub.f32 %v1253_v2, %v1256_v32  ;;  %v2647_v2 = vld [vmem:[%s3451_s6 + $0x78] sm:$0xff]  }
 0xeaf   :  { %v1258_v46 = vmul.f32 1.442695, %v1257_v33 }
 0xeb1   :  { %2712 = vpow2.f32 %v1258_v46 }
 0xebb   :  { %v2713_v49 = vpop.eup %2712 }
 0xebc   :  { %2471 = vmatmul.mubr.msk.f32.vlgmr.msra.gmra.mrb[16].mxu0 %vm628_vm3, %v2713_v49 }
 0xebd   :  { %2489 = vmatprep.mubr.msk.bf16.mxu0 %vm2725_vm2, %v2724_v19  ;;  %2482 = vmatpush3.bf16.msra.mxu0 %v2632_v3 }
 0xebe   :  { %2483 = vmatprep.subr.bf16.mxu0 %v2724_v19 }
 0xec1   :  { %2484 = vmatpush3.bf16.msra.mxu0 %v2633_v36 }
 0xec2   :  { %2485 = vmatprep.subr.bf16.mxu0 %v2724_v19 }
 0xec5   :  { %2486 = vmatpush3.bf16.msra.mxu0 %v2634_v34 }
 0xec6   :  { %2487 = vmatprep.subr.bf16.mxu0 %v2724_v19 }
 0xec9   :  { %2488 = vmatpush3.bf16.msra.mxu0 %v2635_v39 }
 0xeca   :  { %2505 = vmatprep.subr.bf16.mxu0 %v2724_v19 }
 0xf8f   :  { %v1329_v35 = vpop.f32.mrb[16].mxu0 }
 0xf90   :  { %v1333_v50 = vmax.f32 %v1329_v35, 1e-30  ;;  %v2472_v37 = vpop.f32.mrb[17].mxu0 }
 0xf92   :  { %2714 = vrcp.f32 %v1333_v50 }
 0xf9c   :  { %v2715_v10 = vpop.eup %2714 }
 0xf9d   :  { %v1335_v26 = vmul.f32 %v2715_v10, %v2713_v49 }
 0xf9f   :  { %v1336_v38 = vpack.c.bf16 %v1335_v26, %v1335_v26 }
 0xfa1   :  { %2478 = vmatmul.mubr.msk.bf16.vlgmr.msra.gmra.mrb[28].mxu1 %vm628_vm3, %v1336_v38 }
 0xfa2   :  { %2501 = vmatprep.mubr.msk.bf16.mxu1 %vm2725_vm2, %v2724_v19  ;;  %2494 = vmatpush3.bf16.msra.mxu1 %v2636_v4  ;;  %v2661_v4 = vld [vmem:[%s3454_s14 + $0x28] ss:$16 sps:$4 sm:$0xff]  }
 0xfa3   :  { %2495 = vmatprep.subr.bf16.mxu1 %v2724_v19 }
0x1074   :  { %v1374_v40 = vpop.f32.mrb[28].mxu1 }
0x1075   :  { %v1380_v41 = vpack.c.bf16 %v1374_v40, %v1374_v40  ;;  %v2479_v44 = vpop.f32.mrb[29].mxu1 }
0x1076   :  { %v1377_v45 = vpop.f32.mrb[30].mxu1 }
0x1077   :  { %v2480_v48 = vpop.f32.mrb[31].mxu1  ;;  %2490 = vmatmul.mubr.msk.bf16.vlgmr.msra.gmra.mrb[20].mxu0 %vm417_vm0, %v1380_v41  ;;  %v1600_v41 = vrot.slane %v3177_v53, %v970_v25  ;;  %v2649_v25 = vld [vmem:[%s3453_s13 + $0x8] sm:$0xff]   ;;  %v2650_v53 = vld [vmem:[%s3453_s13 + $0x10] sm:$0xff]  }
0x1078   :  { %2521 = vmatprep.mubr.msk.bf16.mxu0 %vm2725_vm2, %v2724_v19  ;;  %2506 = vmatpush3.bf16.msra.mxu0 %v2640_v22 }
0x1079   :  { %2507 = vmatprep.subr.bf16.mxu0 %v2724_v19 }
0x107c   :  { %2508 = vmatpush3.bf16.msra.mxu0 %v2641_v23 }
0x107d   :  { %2509 = vmatprep.subr.bf16.mxu0 %v2724_v19 }
0x1080   :  { %2510 = vmatpush3.bf16.msra.mxu0 %v2642_v43  ;;  %v1690_v43 = vld [vmem:[%s3455_s12] sm:$0x3] }
0x1081   :  { %2511 = vmatprep.subr.bf16.mxu0 %v2724_v19 }
0x1084   :  { %2512 = vmatpush3.bf16.msra.mxu0 %v2643_v24  ;;  %v1707_v24 = vrot.slane %v1690_v43, %v2965_v9 }
0x1085   :  { %2513 = vmatprep.subr.bf16.mxu0 %v2724_v19 }
0x1088   :  { %2514 = vmatpush3.bf16.msra.mxu0 %v2644_v28 }
0x1089   :  { %2515 = vmatprep.subr.bf16.mxu0 %v2724_v19 }
0x108c   :  { %2516 = vmatpush3.bf16.msra.mxu0 %v2645_v29 }
0x108d   :  { %2517 = vmatprep.subr.bf16.mxu0 %v2724_v19 }
0x1090   :  { %2518 = vmatpush3.bf16.msra.mxu0 %v2646_v30  ;;  %v1712_v30 = vrot.slane %v1690_v43, %v2973_v11 }
0x1091   :  { %2519 = vmatprep.subr.bf16.mxu0 %v2724_v19 }
0x1094   :  { %2520 = vmatpush3.bf16.msra.mxu0 %v2647_v2 }
0x114a   :  { %v1455_v52 = vpop.f32.mrb[20].mxu0 }
0x114b   :  { %v1456_v54 = vadd.f32 %v1455_v52, %v1393_v51  ;;  %v2491_v55 = vpop.f32.mrb[21].mxu0 }
0x114c   :  { %v1458_v56 = vpop.f32.mrb[22].mxu0 }
0x114d   :  { %v3233_v57 = vadd.f32 %v1456_v54, %v3143_v47  ;;  %v2492_v58 = vpop.f32.mrb[23].mxu0  ;;  %v2637_v47 = vld [vmem:[%s3450_s5 + $0x28] sm:$0xff]  }
0x114e   :  { %2496 = vmatpush3.bf16.msra.mxu1 %v2637_v47  ;;  %v2669_v47 = vld [vmem:[%s3454_s14 + $0x4c] ss:$16 sps:$4 sm:$0xff]  }
0x114f   :  { %v1462_v59 = vsel %vm417_vm0, %v3233_v57, 0.0  ;;  %2497 = vmatprep.subr.bf16.mxu1 %v2724_v19 }
0x1150   :  { %1463 = vadd.xlane.f32.xlu0 %v1462_v59 }
0x1152   :  { %2498 = vmatpush3.bf16.msra.mxu1 %v2638_v5  ;;  %v2667_v5 = vld [vmem:[%s3454_s14 + $0x48] ss:$16 sps:$4 sm:$0xff]  }
0x1153   :  { %2499 = vmatprep.subr.bf16.mxu1 %v2724_v19 }
0x1156   :  { %2500 = vmatpush3.bf16.msra.mxu1 %v2639_v6  ;;  %v2675_v6 = vld [vmem:[%s3454_s14 + $0x6c] ss:$16 sps:$4 sm:$0xff]  }
0x1157   :  { %2525 = vmatprep.subr.bf16.mxu1 %v2724_v19 }
0x11dd   :  { %v1464_v60 = vpop.xlane.xlu0 %1463 }
0x11de   :  { %v1465_v61 = vmul.f32 0.015625, %v1464_v60 }
0x11e0   :  { %v1466_v62 = vsub.f32 %v3233_v57, %v1465_v61 }
0x11e2   :  { %v1467_v63 = vmul.f32 %v1466_v62, %v1466_v62 }
0x11e4   :  { %v1468_v0 = vsel %vm417_vm0, %v1467_v63, 0.0  ;;  %v2655_v63 = vld [vmem:[%s3454_s14 + $0x8] ss:$16 sps:$4 sm:$0xff]  }
0x11e5   :  { %1469 = vadd.xlane.f32.xlu1 %v1468_v0  ;;  %v2657_v0 = vld [vmem:[%s3454_s14 + $0xc] ss:$16 sps:$4 sm:$0xff]  }
0x11e6   :  { %2046 = vmatprep.subr.bf16.mxu0 %v2657_v0 }
0x1272   :  { %v1470_v7 = vpop.xlane.xlu1 %1469 }
0x1273   :  { %v1471_v12 = vmul.f32 0.015625, %v1470_v7  ;;  %v2673_v7 = vld [vmem:[%s3454_s14 + $0x68] ss:$16 sps:$4 sm:$0xff]  }
0x1275   :  { %v1472_v13 = vadd.f32 1e-05, %v1471_v12  ;;  %v2681_v12 = vld [vmem:[%s3454_s14 + $0x8c] ss:$16 sps:$4 sm:$0xff]  }
0x1277   :  { %2716 = vrsqrt.f32 %v1472_v13  ;;  %v2679_v13 = vld [vmem:[%s3454_s14 + $0x88] ss:$16 sps:$4 sm:$0xff]  }
0x1281   :  { %v2717_v15 = vpop.eup %2716 }
0x1282   :  { %v1474_v16 = vmul.f32 %v2717_v15, %v1466_v62  ;;  %v2654_v62 = vld [vmem:[%s3454_s14 + $0x4] ss:$16 sps:$4 sm:$0xff]   ;;  %v2685_v15 = vld [vmem:[%s3454_s14 + $0xa8] ss:$16 sps:$4 sm:$0xff]  }
0x1284   :  { %v1479_v21 = vmul.f32 %v1478_v14, %v1474_v16  ;;  %v2687_v14 = vld [vmem:[%s3454_s14 + $0xac] ss:$16 sps:$4 sm:$0xff]  }
0x1285   :  { %v2693_v16 = vld [vmem:[%s3454_s14 + $0xcc] ss:$16 sps:$4 sm:$0xff]  }
0x1286   :  { %v1484_v20 = vadd.f32 %v1483_v17, %v1479_v21  ;;  %v2691_v17 = vld [vmem:[%s3454_s14 + $0xc8] ss:$16 sps:$4 sm:$0xff]   ;;  %v2699_v21 = vld [vmem:[%s3454_s14 + $0xec] ss:$16 sps:$4 sm:$0xff]  }
0x1288   :  { %v1485_v27 = vpack.c.bf16 %v1484_v20, %v1484_v20  ;;  %v2697_v20 = vld [vmem:[%s3454_s14 + $0xe8] ss:$16 sps:$4 sm:$0xff]  }
0x128a   :  { %2502 = vmatmul.mubr.msk.bf16.vlgmr.msra.gmra.mrb[32].mxu1 %vm417_vm0, %v1485_v27 }
0x128b   :  { %2533 = vmatprep.mubr.msk.bf16.mxu1 %vm2725_vm2, %v2724_v19  ;;  %2526 = vmatpush3.bf16.msra.mxu1 %v2648_v8 }
0x128c   :  { %2527 = vmatprep.subr.bf16.mxu1 %v2724_v19 }
0x128f   :  { %2528 = vmatpush3.bf16.msra.mxu1 %v2649_v25 }
0x1290   :  { %2529 = vmatprep.subr.bf16.mxu1 %v2724_v19 }
0x1293   :  { %2530 = vmatpush3.bf16.msra.mxu1 %v2650_v53 }
0x1294   :  { %2531 = vmatprep.subr.bf16.mxu1 %v2724_v19  ;;  %v2663_v19 = vld [vmem:[%s3454_s14 + $0x2c] ss:$16 sps:$4 sm:$0xff]  }
0x135d   :  { %v1564_v32 = vpop.f32.mrb[32].mxu1 }
0x135e   :  { %v1565_v33 = vadd.f32 %v2207_v31, %v1564_v32  ;;  %v2503_v46 = vpop.f32.mrb[33].mxu1  ;;  %v2652_v32 = vld [vmem:[%s3454_s14] ss:$16 sps:$4 sm:$0xff]  }
0x135f   :  { %v1567_v49 = vpop.f32.mrb[34].mxu1  ;;  %v2660_v46 = vld [vmem:[%s3454_s14 + $0x24] ss:$16 sps:$4 sm:$0xff]  }
0x1360   :  { %v1570_v3 = vmul.f32 %v1565_v33, %v1565_v33  ;;  %v2504_v36 = vpop.f32.mrb[35].mxu1  ;;  %v2658_v49 = vld [vmem:[%s3454_s14 + $0x20] ss:$16 sps:$4 sm:$0xff]  }
0x1361   :  { %v2664_v36 = vld [vmem:[%s3454_s14 + $0x40] ss:$16 sps:$4 sm:$0xff]  }
0x1362   :  { %v1571_v34 = vmul.f32 %v1570_v3, %v1565_v33  ;;  %v2666_v3 = vld [vmem:[%s3454_s14 + $0x44] ss:$16 sps:$4 sm:$0xff]  }
0x1364   :  { %v1572_v35 = vmul.f32 0.044715, %v1571_v34  ;;  %v2672_v34 = vld [vmem:[%s3454_s14 + $0x64] ss:$16 sps:$4 sm:$0xff]  }
0x1366   :  { %v1573_v50 = vadd.f32 %v1572_v35, %v1565_v33  ;;  %v2678_v35 = vld [vmem:[%s3454_s14 + $0x84] ss:$16 sps:$4 sm:$0xff]  }
0x1368   :  { %v1574_v37 = vmul.f32 0.7978846, %v1573_v50  ;;  %v2676_v50 = vld [vmem:[%s3454_s14 + $0x80] ss:$16 sps:$4 sm:$0xff]  }
0x136a   :  { %2718 = vtanh.f32 %v1574_v37  ;;  %v2684_v37 = vld [vmem:[%s3454_s14 + $0xa4] ss:$16 sps:$4 sm:$0xff]  }
0x1374   :  { %v2719_v10 = vpop.eup %2718 }
0x1375   :  { %v1576_v26 = vadd.f32 1.0, %v2719_v10  ;;  %v2682_v10 = vld [vmem:[%s3454_s14 + $0xa0] ss:$16 sps:$4 sm:$0xff]  }
0x1377   :  { %v1577_v38 = vmul.f32 0.5, %v1576_v26  ;;  %v2690_v26 = vld [vmem:[%s3454_s14 + $0xc4] ss:$16 sps:$4 sm:$0xff]  }
0x1379   :  { %v1578_v39 = vmul.f32 %v1577_v38, %v1565_v33  ;;  %v2688_v38 = vld [vmem:[%s3454_s14 + $0xc0] ss:$16 sps:$4 sm:$0xff]  }
0x137b   :  { %v1579_v40 = vpack.c.bf16 %v1578_v39, %v1578_v39  ;;  %v2696_v39 = vld [vmem:[%s3454_s14 + $0xe4] ss:$16 sps:$4 sm:$0xff]  }
0x137d   :  { %2522 = vmatmul.mubr.bf16.vlgmr.msra.gmra.mrb[24].mxu0 %v1579_v40  ;;  %v2694_v40 = vld [vmem:[%s3454_s14 + $0xe0] ss:$16 sps:$4 sm:$0xff]  }
0x137e   :  { %2078 = vmatprep.mubr.bf16.mxu0 %v2722_v1  ;;  %2047 = vmatpush1.bf16.msra.mxu0 %v2655_v63 }
0x137f   :  { %2048 = vmatprep.subr.bf16.mxu0 %v2663_v19 }
0x1382   :  { %2049 = vmatpush1.bf16.msra.mxu0 %v2661_v4 }
0x1383   :  { %2050 = vmatprep.subr.bf16.mxu0 %v2669_v47 }
0x1386   :  { %2051 = vmatpush1.bf16.msra.mxu0 %v2667_v5 }
0x1387   :  { %2052 = vmatprep.subr.bf16.mxu0 %v2675_v6 }
0x138a   :  { %2053 = vmatpush1.bf16.msra.mxu0 %v2673_v7 }
0x138b   :  { %2054 = vmatprep.subr.bf16.mxu0 %v2681_v12 }
0x138e   :  { %2055 = vmatpush1.bf16.msra.mxu0 %v2679_v13 }
0x138f   :  { %2056 = vmatprep.subr.bf16.mxu0 %v2687_v14 }
0x1392   :  { %2057 = vmatpush1.bf16.msra.mxu0 %v2685_v15 }
0x1393   :  { %2058 = vmatprep.subr.bf16.mxu0 %v2693_v16 }
0x1396   :  { %2059 = vmatpush1.bf16.msra.mxu0 %v2691_v17 }
0x1397   :  { %2060 = vmatprep.subr.bf16.mxu0 %v2699_v21 }
0x139a   :  { %2061 = vmatpush1.bf16.msra.mxu0 %v2697_v20 }
0x1450   :  { %v1683_v44 = vpop.f32.mrb[24].mxu0 }
0x1451   :  { %v1684_v45 = vadd.f32 %v1683_v44, %v1600_v41  ;;  %v2523_v48 = vpop.f32.mrb[25].mxu0 }
0x1452   :  { %v1686_v51 = vpop.f32.mrb[26].mxu0 }
0x1453   :  { %v2524_v52 = vpop.f32.mrb[27].mxu0  ;;  %v1689_v54 = vadd.f32 %v1684_v45, %v3233_v57  ;;  %v2651_v57 = vld [vmem:[%s3453_s13 + $0x18] sm:$0xff]  }
0x1454   :  { %2532 = vmatpush3.bf16.msra.mxu1 %v2651_v57  ;;  %v1823_v52 = vld [vmem:[%s3456_s15] sm:$0xf] }
0x1455   :  { %v1691_v55 = vsel %vm417_vm0, %v1689_v54, 0.0  ;;  %2005 = vmatprep.subr.bf16.mxu1 %v2654_v62 }
0x1456   :  { %1692 = vadd.xlane.f32.xlu0 %v1691_v55  ;;  %v1836_v55 = vrot.slane %v1823_v52, %v3060_v18 }
0x14e3   :  { %v1693_v56 = vpop.xlane.xlu0 %1692 }
0x14e4   :  { %v1694_v58 = vmul.f32 0.015625, %v1693_v56  ;;  %v1832_v56 = vrot.slane %v1823_v52, %v2973_v11 }
0x14e6   :  { %v1695_v59 = vsub.f32 %v1689_v54, %v1694_v58  ;;  %v1828_v54 = vrot.slane %v1823_v52, %v2965_v9  ;;  %v1840_v58 = vrot.slane %v1823_v52, %v3087_v42 }
0x14e8   :  { %v1696_v60 = vmul.f32 %v1695_v59, %v1695_v59 }
0x14ea   :  { %v1697_v61 = vsel %vm417_vm0, %v1696_v60, 0.0 }
0x14eb   :  { %1698 = vadd.xlane.f32.xlu1 %v1697_v61 }
0x1578   :  { %v1699_v27 = vpop.xlane.xlu1 %1698 }
0x1579   :  { %v1700_v22 = vmul.f32 0.015625, %v1699_v27 }
0x157b   :  { %v1701_v23 = vadd.f32 1e-05, %v1700_v22 }
0x157d   :  { %2720 = vrsqrt.f32 %v1701_v23 }
0x1587   :  { %v2721_v28 = vpop.eup %2720 }
0x1588   :  { %v1703_v29 = vmul.f32 %v2721_v28, %v1695_v59 }
0x158a   :  { %v1708_v2 = vmul.f32 %v1707_v24, %v1703_v29 }
0x158c   :  { %v1713_v31 = vadd.f32 %v1712_v30, %v1708_v2 }
0x158e   :  { %v1714_v33 = vpack.c.bf16 %v1713_v31, %v1713_v31 }
0x1590   :  { %2534 = vmatmul.mubr.msk.bf16.vlgmr.msra.gmra.mrb[36].mxu1 %vm417_vm0, %v1714_v33 }
0x1591   :  { %2006 = vmatpush1.bf16.msra.mxu1 %v2652_v32  ;;  %2037 = vmatprep.mubr.bf16.mxu1 %v2722_v1  ;;  %v2670_v1 = vld [vmem:[%s3454_s14 + $0x60] ss:$16 sps:$4 sm:$0xff]  }
0x1592   :  { %2007 = vmatprep.subr.bf16.mxu1 %v2660_v46 }
0x1595   :  { %2008 = vmatpush1.bf16.msra.mxu1 %v2658_v49 }
0x1596   :  { %2009 = vmatprep.subr.bf16.mxu1 %v2666_v3 }
0x1599   :  { %2010 = vmatpush1.bf16.msra.mxu1 %v2664_v36 }
0x159a   :  { %2011 = vmatprep.subr.bf16.mxu1 %v2672_v34 }
0x159d   :  { %2012 = vmatpush1.bf16.msra.mxu1 %v2670_v1 }
0x159e   :  { %2013 = vmatprep.subr.bf16.mxu1 %v2678_v35 }
0x15a1   :  { %2014 = vmatpush1.bf16.msra.mxu1 %v2676_v50 }
0x15a2   :  { %2015 = vmatprep.subr.bf16.mxu1 %v2684_v37 }
0x15a5   :  { %2016 = vmatpush1.bf16.msra.mxu1 %v2682_v10 }
0x15a6   :  { %2017 = vmatprep.subr.bf16.mxu1 %v2690_v26 }
0x15a9   :  { %2018 = vmatpush1.bf16.msra.mxu1 %v2688_v38 }
0x15aa   :  { %2019 = vmatprep.subr.bf16.mxu1 %v2696_v39 }
0x15ad   :  { %2020 = vmatpush1.bf16.msra.mxu1 %v2694_v40 }
0x1663   :  { %v1784_v41 = vpop.f32.mrb[36].mxu1 }
0x1664   :  { %v1790_v44 = vpack.c.bf16 %v1784_v41, %v1784_v41  ;;  %v2535_v45 = vpop.f32.mrb[37].mxu1 }
0x1665   :  { %v1787_v48 = vpop.f32.mrb[38].mxu1 }
0x1666   :  { %v2536_v51 = vpop.f32.mrb[39].mxu1  ;;  %2038 = vmatmul.mubr.bf16.vlgmr.msra.gmra.mrb[40].mxu1 %v1790_v44  ;;  %2079 = vmatmul.mubr.bf16.vlgmr.msra.gmra.mrb[28].mxu0 %v1790_v44 }
0x1739   :  { %v2039_v59 = vpop.f32.mrb[40].mxu1  ;;  %v2080_v60 = vpop.f32.mrb[28].mxu0 }
0x173a   :  { %v2040_v61 = vadd.f32 %v2039_v59, %v1828_v54  ;;  %v2081_v8 = vadd.f32 %v2080_v60, %v1836_v55  ;;  %v2041_v25 = vpop.f32.mrb[41].mxu1  ;;  %v2082_v53 = vpop.f32.mrb[29].mxu0 }
0x173b   :  { %v2042_v57 = vadd.f32 %v2041_v25, %v1832_v56  ;;  %v2083_v62 = vadd.f32 %v2082_v53, %v1840_v58  ;;  %v2043_v63 = vpop.f32.mrb[42].mxu1  ;;  %v2084_v0 = vpop.f32.mrb[30].mxu0 }
0x173c   :  { %2087 = vst [vmem:[%s3457_s16] sm:$0xff] %v2040_v61  ;;  %2089 = vst [vmem:[%s3457_s16 + $0x10] sm:$0xff] %v2081_v8  ;;  %v2044_v9 = vpop.f32.mrb[43].mxu1  ;;  %v2085_v11 = vpop.f32.mrb[31].mxu0 }
0x173d   :  { %2088 = vst [vmem:[%s3457_s16 + $0x8] sm:$0xff] %v2042_v57  ;;  %2090 = vst [vmem:[%s3457_s16 + $0x18] sm:$0xff] %v2083_v62 }

</bundles_post_ra>
